<compile_context>
chip_gen: v7x
topology: tpu7x:2x2x1
jax: 0.10.0
libtpu: 0.0.40
codegen_flags: <defaults>
</compile_context>

<pallas_src>
import math
import jax
import jax.numpy as jnp
from jax import lax
from jax.experimental import pallas as pl
from jax.experimental.pallas import tpu as pltpu  # noqa: F401  (TPU backend assumed)

# ---------------- problem sizes (small, consistent with the module) ----------------
B = 2            # batch
S = 8            # sequence length
D_MODEL = 32
NUM_HEADS = 4
D_K = D_MODEL // NUM_HEADS
D_FF = 64
NUM_LAYERS = 2
VOCAB = 128      # input_vocab_size
EPS = 1e-6
N = B * S        # flattened rows


# ---------------------------- fused Pallas kernel -----------------------------------
def _layer_norm(z, gamma, beta):
    """gamma * (z - mean) / (std_unbiased + eps) + beta   (torch.std -> ddof=1)."""
    d = z.shape[-1]
    mean = jnp.mean(z, axis=-1, keepdims=True)
    var_unbiased = jnp.sum((z - mean) ** 2, axis=-1, keepdims=True) / (d - 1)
    std = jnp.sqrt(var_unbiased)
    inv = pl.reciprocal(std + EPS, approx=False)   # exact; approx=True is a free EUP win if tol allows
    return gamma * (z - mean) * inv + beta


def encoder_kernel(ids_ref, emb_ref, pe_ref,
                   wqkv_ref, bqkv_ref, wo_ref, bo_ref,
                   w1_ref, b1_ref, w2_ref, b2_ref,
                   g1_ref, be1_ref, g2_ref, be2_ref,
                   o_ref):
    """Whole Encoder forward, everything VMEM-resident.

    ids_ref : (N, 1) int32 token ids (rows batch-major: row = b*S + s)
    emb_ref : (V, D)        pe_ref : (N, D)   (pos-enc already tiled over batch)
    per-layer stacks (leading dim = NUM_LAYERS):
      wqkv (L,D,3D)  bqkv (L,1,3D)  wo (L,D,D)  bo (L,1,D)
      w1 (L,D,Dff)   b1 (L,1,Dff)   w2 (L,Dff,D) b2 (L,1,D)
      g1/be1/g2/be2 (L,1,D)
    o_ref : (B, S, D)
    """
    # --- embedding lookup as a one-hot MXU matmul (exact row-select) ---
    ids = ids_ref[...]                                          # (N, 1) int32
    iota = lax.broadcasted_iota(jnp.int32, (N, VOCAB), 1)       # (N, V)
    onehot = jnp.where(iota == ids, 1.0, 0.0).astype(jnp.float32)
    x = jnp.dot(onehot, emb_ref[...], preferred_element_type=jnp.float32)   # (N, D)

    # --- positional encoding add; dropout in eval mode is identity ---
    x = x + pe_ref[...]

    scale = 1.0 / math.sqrt(D_K)

    for l in range(NUM_LAYERS):                                 # static unrolled layer loop
        wqkv = wqkv_ref[l]          # (D, 3D)
        bqkv = bqkv_ref[l]          # (1, 3D)
        wo = wo_ref[l]              # (D, D)
        bo = bo_ref[l]              # (1, D)
        w1 = w1_ref[l]              # (D, Dff)
        b1 = b1_ref[l]              # (1, Dff)
        w2 = w2_ref[l]              # (Dff, D)
        b2 = b2_ref[l]              # (1, D)
        g1 = g1_ref[l]; be1 = be1_ref[l]
        g2 = g2_ref[l]; be2 = be2_ref[l]

        # ---------------- multi-head self-attention ----------------
        qkv = jnp.dot(x, wqkv, preferred_element_type=jnp.float32) + bqkv   # (N, 3D)

        ctx_heads = []
        for h in range(NUM_HEADS):                              # static, H=4
            lo = h * D_K
            qh = qkv[:, lo:lo + D_K].reshape(B, S, D_K)                         # (B,S,dk)
            kh = qkv[:, D_MODEL + lo:D_MODEL + lo + D_K].reshape(B, S, D_K)
            vh = qkv[:, 2 * D_MODEL + lo:2 * D_MODEL + lo + D_K].reshape(B, S, D_K)

            # batched over B; K^T folded into the contraction (no materialized transpose)
            s = jnp.einsum('bqd,bkd->bqk', qh, kh,
                           preferred_element_type=jnp.float32) * scale          # (B,S,S)
            s = s - jnp.max(s, axis=-1, keepdims=True)                          # stable softmax
            p = jnp.exp(s)
            p = p * pl.reciprocal(jnp.sum(p, axis=-1, keepdims=True), approx=False)
            ctx = jnp.einsum('bqk,bkd->bqd', p, vh,
                             preferred_element_type=jnp.float32)                 # (B,S,dk)
            ctx_heads.append(ctx.reshape(N, D_K))

        ctx_all = jnp.concatenate(ctx_heads, axis=-1)                            # (N, D)
        attn = jnp.dot(ctx_all, wo, preferred_element_type=jnp.float32) + bo     # (N, D)

        # ---------------- add & norm 1 (all in vregs) ----------------
        x = _layer_norm(x + attn, g1, be1)

        # ---------------- feed-forward (dropout = identity in eval) ----------------
        hdn = jnp.maximum(jnp.dot(x, w1, preferred_element_type=jnp.float32) + b1, 0.0)
        ff = jnp.dot(hdn, w2, preferred_element_type=jnp.float32) + b2

        # ---------------- add & norm 2 ----------------
        x = _layer_norm(x + ff, g2, be2)

    o_ref[...] = x.reshape(B, S, D_MODEL).astype(o_ref.dtype)


# ---------------------------- wrappers / params --------------------------------------
def make_positional_encoding(seq_len, d_model):
    """Matches the PyTorch PositionalEncoding buffer for the first `seq_len` positions."""
    pos = jnp.arange(seq_len, dtype=jnp.float32)[:, None]
    div = jnp.exp(jnp.arange(0, d_model, 2, dtype=jnp.float32) * (-math.log(10000.0) / d_model))
    pe = jnp.zeros((seq_len, d_model), jnp.float32)
    pe = pe.at[:, 0::2].set(jnp.sin(pos * div))
    pe = pe.at[:, 1::2].set(jnp.cos(pos * div))
    return pe


def make_params(key):
    """Deterministic synthetic parameters; Linear weights stored (in, out) so y = x@W + b."""
    def lin(k, fan_in, fan_out):
        bound = 1.0 / math.sqrt(fan_in)
        kw, kb = jax.random.split(k)
        w = jax.random.uniform(kw, (fan_in, fan_out), jnp.float32, -bound, bound)
        b = jax.random.uniform(kb, (1, fan_out), jnp.float32, -bound, bound)
        return w, b

    keys = jax.random.split(key, 1 + NUM_LAYERS)
    emb = jax.random.normal(keys[0], (VOCAB, D_MODEL), jnp.float32)   # nn.Embedding ~ N(0,1)

    wqkv, bqkv, wo, bo = [], [], [], []
    w1, b1, w2, b2 = [], [], [], []
    g1, be1, g2, be2 = [], [], [], []
    for l in range(NUM_LAYERS):
        kq, kk, kv, ko, kf1, kf2 = jax.random.split(keys[1 + l], 6)
        wq, bq_ = lin(kq, D_MODEL, D_MODEL)
        wk, bk_ = lin(kk, D_MODEL, D_MODEL)
        wv, bv_ = lin(kv, D_MODEL, D_MODEL)
        wqkv.append(jnp.concatenate([wq, wk, wv], axis=1))            # fused QKV (D, 3D)
        bqkv.append(jnp.concatenate([bq_, bk_, bv_], axis=1))         # (1, 3D)
        w, b = lin(ko, D_MODEL, D_MODEL); wo.append(w); bo.append(b)
        w, b = lin(kf1, D_MODEL, D_FF);   w1.append(w); b1.append(b)
        w, b = lin(kf2, D_FF, D_MODEL);   w2.append(w); b2.append(b)
        g1.append(jnp.ones((1, D_MODEL), jnp.float32)); be1.append(jnp.zeros((1, D_MODEL), jnp.float32))
        g2.append(jnp.ones((1, D_MODEL), jnp.float32)); be2.append(jnp.zeros((1, D_MODEL), jnp.float32))

    stack = lambda xs: jnp.stack(xs, axis=0)
    return {
        "emb": emb,
        "wqkv": stack(wqkv), "bqkv": stack(bqkv),
        "wo": stack(wo), "bo": stack(bo),
        "w1": stack(w1), "b1": stack(b1),
        "w2": stack(w2), "b2": stack(b2),
        "g1": stack(g1), "be1": stack(be1),
        "g2": stack(g2), "be2": stack(be2),
    }


@jax.jit
def encoder_forward(tokens, params):
    """tokens: (B, S) int32 ids  ->  (B, S, D_MODEL) float32."""
    ids = tokens.reshape(N, 1).astype(jnp.int32)
    pe = make_positional_encoding(S, D_MODEL)
    pe_tiled = jnp.tile(pe, (B, 1))        # (N, D): row b*S+s gets pe[s]

    return pl.pallas_call(
        encoder_kernel,
        out_shape=jax.ShapeDtypeStruct((B, S, D_MODEL), jnp.float32),
        # no grid / no BlockSpecs: single invocation, all operands are whole-array
        # VMEM-resident blocks (everything here is ~60 KB total).
    )(ids, params["emb"], pe_tiled,
      params["wqkv"], params["bqkv"], params["wo"], params["bo"],
      params["w1"], params["b1"], params["w2"], params["b2"],
      params["g1"], params["be1"], params["g2"], params["be2"])


# ---------------------------- main ----------------------------------------------------
if __name__ == "__main__":
    root = jax.random.PRNGKey(0)
    kt, kp = jax.random.split(root)

    tokens = jax.random.randint(kt, (B, S), 0, VOCAB, dtype=jnp.int32)
    params = make_params(kp)

    out = encoder_forward(tokens, params)
    out = jax.block_until_ready(out)

    assert out.shape == (B, S, D_MODEL)
    assert bool(jnp.all(jnp.isfinite(out)))
    print("KERNEL_OK")
</pallas_src>

<mosaic_0001>
module attributes {stable_mosaic.version = 11 : i64} {
  func.func @encoder_kernel(%arg0: memref<16x1xi32, #tpu.memory_space<vmem>>, %arg1: memref<128x32xf32, #tpu.memory_space<vmem>>, %arg2: memref<16x32xf32, #tpu.memory_space<vmem>>, %arg3: memref<2x32x96xf32, #tpu.memory_space<vmem>>, %arg4: memref<2x1x96xf32, #tpu.memory_space<vmem>>, %arg5: memref<2x32x32xf32, #tpu.memory_space<vmem>>, %arg6: memref<2x1x32xf32, #tpu.memory_space<vmem>>, %arg7: memref<2x32x64xf32, #tpu.memory_space<vmem>>, %arg8: memref<2x1x64xf32, #tpu.memory_space<vmem>>, %arg9: memref<2x64x32xf32, #tpu.memory_space<vmem>>, %arg10: memref<2x1x32xf32, #tpu.memory_space<vmem>>, %arg11: memref<2x1x32xf32, #tpu.memory_space<vmem>>, %arg12: memref<2x1x32xf32, #tpu.memory_space<vmem>>, %arg13: memref<2x1x32xf32, #tpu.memory_space<vmem>>, %arg14: memref<2x1x32xf32, #tpu.memory_space<vmem>>, %arg15: memref<2x8x32xf32, #tpu.memory_space<vmem>>) attributes {dimension_semantics = [], scalar_prefetch = 0 : i64, scratch_operands = 0 : i64, tpu.core_type = #tpu.core_type<tc>} {
    %c0 = arith.constant 0 : index
    %c0_0 = arith.constant 0 : index
    %0 = vector.load %arg0[%c0, %c0_0] : memref<16x1xi32, #tpu.memory_space<vmem>>, vector<16x1xi32>
    %1 = tpu.iota {dimensions = array<i32: 1>} : vector<16x128xi32>
    %2 = vector.broadcast %0 : vector<16x1xi32> to vector<16x128xi32>
    %3 = arith.cmpi eq, %1, %2 : vector<16x128xi32>
    %cst = arith.constant 1.000000e+00 : f32
    %cst_1 = arith.constant 0.000000e+00 : f32
    %4 = vector.broadcast %cst : f32 to vector<16x128xf32>
    %5 = vector.broadcast %cst_1 : f32 to vector<16x128xf32>
    %6 = arith.select %3, %4, %5 : vector<16x128xi1>, vector<16x128xf32>
    %c0_2 = arith.constant 0 : index
    %c0_3 = arith.constant 0 : index
    %7 = vector.load %arg1[%c0_2, %c0_3] : memref<128x32xf32, #tpu.memory_space<vmem>>, vector<128x32xf32>
    %cst_4 = arith.constant dense<0.000000e+00> : vector<16x32xf32>
    %8 = tpu.matmul %6, %7, %cst_4 {dimension_numbers = #tpu.dot_dimension_numbers<[1], [0], [0], [1], [0, 0, 1, 1], [], []>} : vector<16x128xf32>, vector<128x32xf32>, vector<16x32xf32> -> vector<16x32xf32>
    %c0_5 = arith.constant 0 : index
    %c0_6 = arith.constant 0 : index
    %9 = vector.load %arg2[%c0_5, %c0_6] : memref<16x32xf32, #tpu.memory_space<vmem>>, vector<16x32xf32>
    %10 = arith.addf %8, %9 : vector<16x32xf32>
    %c0_7 = arith.constant 0 : index
    %c0_8 = arith.constant 0 : index
    %c0_9 = arith.constant 0 : index
    %11 = vector.load %arg3[%c0_7, %c0_8, %c0_9] : memref<2x32x96xf32, #tpu.memory_space<vmem>>, vector<1x32x96xf32>
    %12 = vector.shape_cast %11 : vector<1x32x96xf32> to vector<32x96xf32>
    %c0_10 = arith.constant 0 : index
    %c0_11 = arith.constant 0 : index
    %c0_12 = arith.constant 0 : index
    %13 = vector.load %arg4[%c0_10, %c0_11, %c0_12] : memref<2x1x96xf32, #tpu.memory_space<vmem>>, vector<1x1x96xf32>
    %14 = vector.shape_cast %13 : vector<1x1x96xf32> to vector<1x96xf32>
    %c0_13 = arith.constant 0 : index
    %c0_14 = arith.constant 0 : index
    %c0_15 = arith.constant 0 : index
    %15 = vector.load %arg5[%c0_13, %c0_14, %c0_15] : memref<2x32x32xf32, #tpu.memory_space<vmem>>, vector<1x32x32xf32>
    %16 = vector.shape_cast %15 : vector<1x32x32xf32> to vector<32x32xf32>
    %c0_16 = arith.constant 0 : index
    %c0_17 = arith.constant 0 : index
    %c0_18 = arith.constant 0 : index
    %17 = vector.load %arg6[%c0_16, %c0_17, %c0_18] : memref<2x1x32xf32, #tpu.memory_space<vmem>>, vector<1x1x32xf32>
    %18 = vector.shape_cast %17 : vector<1x1x32xf32> to vector<1x32xf32>
    %c0_19 = arith.constant 0 : index
    %c0_20 = arith.constant 0 : index
    %c0_21 = arith.constant 0 : index
    %19 = vector.load %arg7[%c0_19, %c0_20, %c0_21] : memref<2x32x64xf32, #tpu.memory_space<vmem>>, vector<1x32x64xf32>
    %20 = vector.shape_cast %19 : vector<1x32x64xf32> to vector<32x64xf32>
    %c0_22 = arith.constant 0 : index
    %c0_23 = arith.constant 0 : index
    %c0_24 = arith.constant 0 : index
    %21 = vector.load %arg8[%c0_22, %c0_23, %c0_24] : memref<2x1x64xf32, #tpu.memory_space<vmem>>, vector<1x1x64xf32>
    %22 = vector.shape_cast %21 : vector<1x1x64xf32> to vector<1x64xf32>
    %c0_25 = arith.constant 0 : index
    %c0_26 = arith.constant 0 : index
    %c0_27 = arith.constant 0 : index
    %23 = vector.load %arg9[%c0_25, %c0_26, %c0_27] : memref<2x64x32xf32, #tpu.memory_space<vmem>>, vector<1x64x32xf32>
    %24 = vector.shape_cast %23 : vector<1x64x32xf32> to vector<64x32xf32>
    %c0_28 = arith.constant 0 : index
    %c0_29 = arith.constant 0 : index
    %c0_30 = arith.constant 0 : index
    %25 = vector.load %arg10[%c0_28, %c0_29, %c0_30] : memref<2x1x32xf32, #tpu.memory_space<vmem>>, vector<1x1x32xf32>
    %26 = vector.shape_cast %25 : vector<1x1x32xf32> to vector<1x32xf32>
    %c0_31 = arith.constant 0 : index
    %c0_32 = arith.constant 0 : index
    %c0_33 = arith.constant 0 : index
    %27 = vector.load %arg11[%c0_31, %c0_32, %c0_33] : memref<2x1x32xf32, #tpu.memory_space<vmem>>, vector<1x1x32xf32>
    %28 = vector.shape_cast %27 : vector<1x1x32xf32> to vector<1x32xf32>
    %c0_34 = arith.constant 0 : index
    %c0_35 = arith.constant 0 : index
    %c0_36 = arith.constant 0 : index
    %29 = vector.load %arg12[%c0_34, %c0_35, %c0_36] : memref<2x1x32xf32, #tpu.memory_space<vmem>>, vector<1x1x32xf32>
    %30 = vector.shape_cast %29 : vector<1x1x32xf32> to vector<1x32xf32>
    %c0_37 = arith.constant 0 : index
    %c0_38 = arith.constant 0 : index
    %c0_39 = arith.constant 0 : index
    %31 = vector.load %arg13[%c0_37, %c0_38, %c0_39] : memref<2x1x32xf32, #tpu.memory_space<vmem>>, vector<1x1x32xf32>
    %32 = vector.shape_cast %31 : vector<1x1x32xf32> to vector<1x32xf32>
    %c0_40 = arith.constant 0 : index
    %c0_41 = arith.constant 0 : index
    %c0_42 = arith.constant 0 : index
    %33 = vector.load %arg14[%c0_40, %c0_41, %c0_42] : memref<2x1x32xf32, #tpu.memory_space<vmem>>, vector<1x1x32xf32>
    %34 = vector.shape_cast %33 : vector<1x1x32xf32> to vector<1x32xf32>
    %cst_43 = arith.constant dense<0.000000e+00> : vector<16x96xf32>
    %35 = tpu.matmul %10, %12, %cst_43 {dimension_numbers = #tpu.dot_dimension_numbers<[1], [0], [0], [1], [0, 0, 1, 1], [], []>} : vector<16x32xf32>, vector<32x96xf32>, vector<16x96xf32> -> vector<16x96xf32>
    %36 = vector.broadcast %14 : vector<1x96xf32> to vector<16x96xf32>
    %37 = arith.addf %35, %36 : vector<16x96xf32>
    %38 = vector.extract_strided_slice %37 {offsets = [0, 0], sizes = [16, 8], strides = [1, 1]} : vector<16x96xf32> to vector<16x8xf32>
    %39 = vector.shape_cast %38 : vector<16x8xf32> to vector<2x8x8xf32>
    %40 = vector.extract_strided_slice %37 {offsets = [0, 32], sizes = [16, 8], strides = [1, 1]} : vector<16x96xf32> to vector<16x8xf32>
    %41 = vector.shape_cast %40 : vector<16x8xf32> to vector<2x8x8xf32>
    %42 = vector.extract_strided_slice %37 {offsets = [0, 64], sizes = [16, 8], strides = [1, 1]} : vector<16x96xf32> to vector<16x8xf32>
    %43 = vector.shape_cast %42 : vector<16x8xf32> to vector<2x8x8xf32>
    "tpu.trace_start"() <{level = 10 : i32, message = "bqd,bkd->bqk"}> : () -> ()
    %cst_44 = arith.constant dense<0.000000e+00> : vector<2x8x8xf32>
    %44 = tpu.matmul %39, %41, %cst_44 {dimension_numbers = #tpu.dot_dimension_numbers<[2], [2], [1], [1], [0, 0, 0, 1, 1, 1], [0], [0]>} : vector<2x8x8xf32>, vector<2x8x8xf32>, vector<2x8x8xf32> -> vector<2x8x8xf32>
    "tpu.trace_stop"() : () -> ()
    %cst_45 = arith.constant 0.353553385 : f32
    %45 = vector.broadcast %cst_45 : f32 to vector<2x8x8xf32>
    %46 = arith.mulf %44, %45 : vector<2x8x8xf32>
    %cst_46 = arith.constant dense<0xFF800000> : vector<2x8xf32>
    %47 = vector.multi_reduction <maximumf>, %46, %cst_46 [2] : vector<2x8x8xf32> to vector<2x8xf32>
    %48 = vector.shape_cast %47 : vector<2x8xf32> to vector<2x8x1xf32>
    %49 = vector.broadcast %48 : vector<2x8x1xf32> to vector<2x8x8xf32>
    %50 = arith.subf %46, %49 : vector<2x8x8xf32>
    %51 = math.exp %50 : vector<2x8x8xf32>
    %cst_47 = arith.constant dense<0.000000e+00> : vector<2x8xf32>
    %52 = vector.multi_reduction <add>, %51, %cst_47 [2] : vector<2x8x8xf32> to vector<2x8xf32>
    %53 = vector.shape_cast %52 : vector<2x8xf32> to vector<2x8x1xf32>
    %54 = tpu.reciprocal %53 : vector<2x8x1xf32> -> vector<2x8x1xf32>
    %55 = vector.broadcast %54 : vector<2x8x1xf32> to vector<2x8x8xf32>
    %56 = arith.mulf %51, %55 : vector<2x8x8xf32>
    "tpu.trace_start"() <{level = 10 : i32, message = "bqk,bkd->bqd"}> : () -> ()
    %cst_48 = arith.constant dense<0.000000e+00> : vector<2x8x8xf32>
    %57 = tpu.matmul %56, %43, %cst_48 {dimension_numbers = #tpu.dot_dimension_numbers<[2], [1], [1], [2], [0, 0, 0, 1, 1, 2], [0], [0]>} : vector<2x8x8xf32>, vector<2x8x8xf32>, vector<2x8x8xf32> -> vector<2x8x8xf32>
    "tpu.trace_stop"() : () -> ()
    %58 = vector.shape_cast %57 : vector<2x8x8xf32> to vector<16x8xf32>
    %59 = vector.extract_strided_slice %37 {offsets = [0, 8], sizes = [16, 8], strides = [1, 1]} : vector<16x96xf32> to vector<16x8xf32>
    %60 = vector.shape_cast %59 : vector<16x8xf32> to vector<2x8x8xf32>
    %61 = vector.extract_strided_slice %37 {offsets = [0, 40], sizes = [16, 8], strides = [1, 1]} : vector<16x96xf32> to vector<16x8xf32>
    %62 = vector.shape_cast %61 : vector<16x8xf32> to vector<2x8x8xf32>
    %63 = vector.extract_strided_slice %37 {offsets = [0, 72], sizes = [16, 8], strides = [1, 1]} : vector<16x96xf32> to vector<16x8xf32>
    %64 = vector.shape_cast %63 : vector<16x8xf32> to vector<2x8x8xf32>
    "tpu.trace_start"() <{level = 10 : i32, message = "bqd,bkd->bqk"}> : () -> ()
    %cst_49 = arith.constant dense<0.000000e+00> : vector<2x8x8xf32>
    %65 = tpu.matmul %60, %62, %cst_49 {dimension_numbers = #tpu.dot_dimension_numbers<[2], [2], [1], [1], [0, 0, 0, 1, 1, 1], [0], [0]>} : vector<2x8x8xf32>, vector<2x8x8xf32>, vector<2x8x8xf32> -> vector<2x8x8xf32>
    "tpu.trace_stop"() : () -> ()
    %cst_50 = arith.constant 0.353553385 : f32
    %66 = vector.broadcast %cst_50 : f32 to vector<2x8x8xf32>
    %67 = arith.mulf %65, %66 : vector<2x8x8xf32>
    %cst_51 = arith.constant dense<0xFF800000> : vector<2x8xf32>
    %68 = vector.multi_reduction <maximumf>, %67, %cst_51 [2] : vector<2x8x8xf32> to vector<2x8xf32>
    %69 = vector.shape_cast %68 : vector<2x8xf32> to vector<2x8x1xf32>
    %70 = vector.broadcast %69 : vector<2x8x1xf32> to vector<2x8x8xf32>
    %71 = arith.subf %67, %70 : vector<2x8x8xf32>
    %72 = math.exp %71 : vector<2x8x8xf32>
    %cst_52 = arith.constant dense<0.000000e+00> : vector<2x8xf32>
    %73 = vector.multi_reduction <add>, %72, %cst_52 [2] : vector<2x8x8xf32> to vector<2x8xf32>
    %74 = vector.shape_cast %73 : vector<2x8xf32> to vector<2x8x1xf32>
    %75 = tpu.reciprocal %74 : vector<2x8x1xf32> -> vector<2x8x1xf32>
    %76 = vector.broadcast %75 : vector<2x8x1xf32> to vector<2x8x8xf32>
    %77 = arith.mulf %72, %76 : vector<2x8x8xf32>
    "tpu.trace_start"() <{level = 10 : i32, message = "bqk,bkd->bqd"}> : () -> ()
    %cst_53 = arith.constant dense<0.000000e+00> : vector<2x8x8xf32>
    %78 = tpu.matmul %77, %64, %cst_53 {dimension_numbers = #tpu.dot_dimension_numbers<[2], [1], [1], [2], [0, 0, 0, 1, 1, 2], [0], [0]>} : vector<2x8x8xf32>, vector<2x8x8xf32>, vector<2x8x8xf32> -> vector<2x8x8xf32>
    "tpu.trace_stop"() : () -> ()
    %79 = vector.shape_cast %78 : vector<2x8x8xf32> to vector<16x8xf32>
    %80 = vector.extract_strided_slice %37 {offsets = [0, 16], sizes = [16, 8], strides = [1, 1]} : vector<16x96xf32> to vector<16x8xf32>
    %81 = vector.shape_cast %80 : vector<16x8xf32> to vector<2x8x8xf32>
    %82 = vector.extract_strided_slice %37 {offsets = [0, 48], sizes = [16, 8], strides = [1, 1]} : vector<16x96xf32> to vector<16x8xf32>
    %83 = vector.shape_cast %82 : vector<16x8xf32> to vector<2x8x8xf32>
    %84 = vector.extract_strided_slice %37 {offsets = [0, 80], sizes = [16, 8], strides = [1, 1]} : vector<16x96xf32> to vector<16x8xf32>
    %85 = vector.shape_cast %84 : vector<16x8xf32> to vector<2x8x8xf32>
    "tpu.trace_start"() <{level = 10 : i32, message = "bqd,bkd->bqk"}> : () -> ()
    %cst_54 = arith.constant dense<0.000000e+00> : vector<2x8x8xf32>
    %86 = tpu.matmul %81, %83, %cst_54 {dimension_numbers = #tpu.dot_dimension_numbers<[2], [2], [1], [1], [0, 0, 0, 1, 1, 1], [0], [0]>} : vector<2x8x8xf32>, vector<2x8x8xf32>, vector<2x8x8xf32> -> vector<2x8x8xf32>
    "tpu.trace_stop"() : () -> ()
    %cst_55 = arith.constant 0.353553385 : f32
    %87 = vector.broadcast %cst_55 : f32 to vector<2x8x8xf32>
    %88 = arith.mulf %86, %87 : vector<2x8x8xf32>
    %cst_56 = arith.constant dense<0xFF800000> : vector<2x8xf32>
    %89 = vector.multi_reduction <maximumf>, %88, %cst_56 [2] : vector<2x8x8xf32> to vector<2x8xf32>
    %90 = vector.shape_cast %89 : vector<2x8xf32> to vector<2x8x1xf32>
    %91 = vector.broadcast %90 : vector<2x8x1xf32> to vector<2x8x8xf32>
    %92 = arith.subf %88, %91 : vector<2x8x8xf32>
    %93 = math.exp %92 : vector<2x8x8xf32>
    %cst_57 = arith.constant dense<0.000000e+00> : vector<2x8xf32>
    %94 = vector.multi_reduction <add>, %93, %cst_57 [2] : vector<2x8x8xf32> to vector<2x8xf32>
    %95 = vector.shape_cast %94 : vector<2x8xf32> to vector<2x8x1xf32>
    %96 = tpu.reciprocal %95 : vector<2x8x1xf32> -> vector<2x8x1xf32>
    %97 = vector.broadcast %96 : vector<2x8x1xf32> to vector<2x8x8xf32>
    %98 = arith.mulf %93, %97 : vector<2x8x8xf32>
    "tpu.trace_start"() <{level = 10 : i32, message = "bqk,bkd->bqd"}> : () -> ()
    %cst_58 = arith.constant dense<0.000000e+00> : vector<2x8x8xf32>
    %99 = tpu.matmul %98, %85, %cst_58 {dimension_numbers = #tpu.dot_dimension_numbers<[2], [1], [1], [2], [0, 0, 0, 1, 1, 2], [0], [0]>} : vector<2x8x8xf32>, vector<2x8x8xf32>, vector<2x8x8xf32> -> vector<2x8x8xf32>
    "tpu.trace_stop"() : () -> ()
    %100 = vector.shape_cast %99 : vector<2x8x8xf32> to vector<16x8xf32>
    %101 = vector.extract_strided_slice %37 {offsets = [0, 24], sizes = [16, 8], strides = [1, 1]} : vector<16x96xf32> to vector<16x8xf32>
    %102 = vector.shape_cast %101 : vector<16x8xf32> to vector<2x8x8xf32>
    %103 = vector.extract_strided_slice %37 {offsets = [0, 56], sizes = [16, 8], strides = [1, 1]} : vector<16x96xf32> to vector<16x8xf32>
    %104 = vector.shape_cast %103 : vector<16x8xf32> to vector<2x8x8xf32>
    %105 = vector.extract_strided_slice %37 {offsets = [0, 88], sizes = [16, 8], strides = [1, 1]} : vector<16x96xf32> to vector<16x8xf32>
    %106 = vector.shape_cast %105 : vector<16x8xf32> to vector<2x8x8xf32>
    "tpu.trace_start"() <{level = 10 : i32, message = "bqd,bkd->bqk"}> : () -> ()
    %cst_59 = arith.constant dense<0.000000e+00> : vector<2x8x8xf32>
    %107 = tpu.matmul %102, %104, %cst_59 {dimension_numbers = #tpu.dot_dimension_numbers<[2], [2], [1], [1], [0, 0, 0, 1, 1, 1], [0], [0]>} : vector<2x8x8xf32>, vector<2x8x8xf32>, vector<2x8x8xf32> -> vector<2x8x8xf32>
    "tpu.trace_stop"() : () -> ()
    %cst_60 = arith.constant 0.353553385 : f32
    %108 = vector.broadcast %cst_60 : f32 to vector<2x8x8xf32>
    %109 = arith.mulf %107, %108 : vector<2x8x8xf32>
    %cst_61 = arith.constant dense<0xFF800000> : vector<2x8xf32>
    %110 = vector.multi_reduction <maximumf>, %109, %cst_61 [2] : vector<2x8x8xf32> to vector<2x8xf32>
    %111 = vector.shape_cast %110 : vector<2x8xf32> to vector<2x8x1xf32>
    %112 = vector.broadcast %111 : vector<2x8x1xf32> to vector<2x8x8xf32>
    %113 = arith.subf %109, %112 : vector<2x8x8xf32>
    %114 = math.exp %113 : vector<2x8x8xf32>
    %cst_62 = arith.constant dense<0.000000e+00> : vector<2x8xf32>
    %115 = vector.multi_reduction <add>, %114, %cst_62 [2] : vector<2x8x8xf32> to vector<2x8xf32>
    %116 = vector.shape_cast %115 : vector<2x8xf32> to vector<2x8x1xf32>
    %117 = tpu.reciprocal %116 : vector<2x8x1xf32> -> vector<2x8x1xf32>
    %118 = vector.broadcast %117 : vector<2x8x1xf32> to vector<2x8x8xf32>
    %119 = arith.mulf %114, %118 : vector<2x8x8xf32>
    "tpu.trace_start"() <{level = 10 : i32, message = "bqk,bkd->bqd"}> : () -> ()
    %cst_63 = arith.constant dense<0.000000e+00> : vector<2x8x8xf32>
    %120 = tpu.matmul %119, %106, %cst_63 {dimension_numbers = #tpu.dot_dimension_numbers<[2], [1], [1], [2], [0, 0, 0, 1, 1, 2], [0], [0]>} : vector<2x8x8xf32>, vector<2x8x8xf32>, vector<2x8x8xf32> -> vector<2x8x8xf32>
    "tpu.trace_stop"() : () -> ()
    %121 = vector.shape_cast %120 : vector<2x8x8xf32> to vector<16x8xf32>
    %122 = tpu.concatenate %58, %79, %100, %121 in 1 : vector<16x8xf32>, vector<16x8xf32>, vector<16x8xf32>, vector<16x8xf32> -> vector<16x32xf32>
    %cst_64 = arith.constant dense<0.000000e+00> : vector<16x32xf32>
    %123 = tpu.matmul %122, %16, %cst_64 {dimension_numbers = #tpu.dot_dimension_numbers<[1], [0], [0], [1], [0, 0, 1, 1], [], []>} : vector<16x32xf32>, vector<32x32xf32>, vector<16x32xf32> -> vector<16x32xf32>
    %124 = vector.broadcast %18 : vector<1x32xf32> to vector<16x32xf32>
    %125 = arith.addf %123, %124 : vector<16x32xf32>
    %126 = arith.addf %10, %125 : vector<16x32xf32>
    %cst_65 = arith.constant dense<0.000000e+00> : vector<16xf32>
    %127 = vector.multi_reduction <add>, %126, %cst_65 [1] : vector<16x32xf32> to vector<16xf32>
    %128 = vector.shape_cast %127 : vector<16xf32> to vector<16x1xf32>
    %cst_66 = arith.constant 3.200000e+01 : f32
    %129 = vector.broadcast %cst_66 : f32 to vector<16x1xf32>
    %130 = arith.divf %128, %129 : vector<16x1xf32>
    %131 = vector.broadcast %130 : vector<16x1xf32> to vector<16x32xf32>
    %132 = arith.subf %126, %131 : vector<16x32xf32>
    %133 = arith.mulf %132, %132 : vector<16x32xf32>
    %cst_67 = arith.constant dense<0.000000e+00> : vector<16xf32>
    %134 = vector.multi_reduction <add>, %133, %cst_67 [1] : vector<16x32xf32> to vector<16xf32>
    %135 = vector.shape_cast %134 : vector<16xf32> to vector<16x1xf32>
    %cst_68 = arith.constant 3.100000e+01 : f32
    %136 = vector.broadcast %cst_68 : f32 to vector<16x1xf32>
    %137 = arith.divf %135, %136 : vector<16x1xf32>
    %138 = math.sqrt %137 : vector<16x1xf32>
    %cst_69 = arith.constant 9.99999997E-7 : f32
    %139 = vector.broadcast %cst_69 : f32 to vector<16x1xf32>
    %140 = arith.addf %138, %139 : vector<16x1xf32>
    %141 = tpu.reciprocal %140 : vector<16x1xf32> -> vector<16x1xf32>
    %142 = vector.broadcast %130 : vector<16x1xf32> to vector<16x32xf32>
    %143 = arith.subf %126, %142 : vector<16x32xf32>
    %144 = vector.broadcast %28 : vector<1x32xf32> to vector<16x32xf32>
    %145 = arith.mulf %144, %143 : vector<16x32xf32>
    %146 = vector.broadcast %141 : vector<16x1xf32> to vector<16x32xf32>
    %147 = arith.mulf %145, %146 : vector<16x32xf32>
    %148 = vector.broadcast %30 : vector<1x32xf32> to vector<16x32xf32>
    %149 = arith.addf %147, %148 : vector<16x32xf32>
    %cst_70 = arith.constant dense<0.000000e+00> : vector<16x64xf32>
    %150 = tpu.matmul %149, %20, %cst_70 {dimension_numbers = #tpu.dot_dimension_numbers<[1], [0], [0], [1], [0, 0, 1, 1], [], []>} : vector<16x32xf32>, vector<32x64xf32>, vector<16x64xf32> -> vector<16x64xf32>
    %151 = vector.broadcast %22 : vector<1x64xf32> to vector<16x64xf32>
    %152 = arith.addf %150, %151 : vector<16x64xf32>
    %cst_71 = arith.constant 0.000000e+00 : f32
    %153 = vector.broadcast %cst_71 : f32 to vector<16x64xf32>
    %154 = arith.maximumf %152, %153 : vector<16x64xf32>
    %cst_72 = arith.constant dense<0.000000e+00> : vector<16x32xf32>
    %155 = tpu.matmul %154, %24, %cst_72 {dimension_numbers = #tpu.dot_dimension_numbers<[1], [0], [0], [1], [0, 0, 1, 1], [], []>} : vector<16x64xf32>, vector<64x32xf32>, vector<16x32xf32> -> vector<16x32xf32>
    %156 = vector.broadcast %26 : vector<1x32xf32> to vector<16x32xf32>
    %157 = arith.addf %155, %156 : vector<16x32xf32>
    %158 = arith.addf %149, %157 : vector<16x32xf32>
    %cst_73 = arith.constant dense<0.000000e+00> : vector<16xf32>
    %159 = vector.multi_reduction <add>, %158, %cst_73 [1] : vector<16x32xf32> to vector<16xf32>
    %160 = vector.shape_cast %159 : vector<16xf32> to vector<16x1xf32>
    %cst_74 = arith.constant 3.200000e+01 : f32
    %161 = vector.broadcast %cst_74 : f32 to vector<16x1xf32>
    %162 = arith.divf %160, %161 : vector<16x1xf32>
    %163 = vector.broadcast %162 : vector<16x1xf32> to vector<16x32xf32>
    %164 = arith.subf %158, %163 : vector<16x32xf32>
    %165 = arith.mulf %164, %164 : vector<16x32xf32>
    %cst_75 = arith.constant dense<0.000000e+00> : vector<16xf32>
    %166 = vector.multi_reduction <add>, %165, %cst_75 [1] : vector<16x32xf32> to vector<16xf32>
    %167 = vector.shape_cast %166 : vector<16xf32> to vector<16x1xf32>
    %cst_76 = arith.constant 3.100000e+01 : f32
    %168 = vector.broadcast %cst_76 : f32 to vector<16x1xf32>
    %169 = arith.divf %167, %168 : vector<16x1xf32>
    %170 = math.sqrt %169 : vector<16x1xf32>
    %cst_77 = arith.constant 9.99999997E-7 : f32
    %171 = vector.broadcast %cst_77 : f32 to vector<16x1xf32>
    %172 = arith.addf %170, %171 : vector<16x1xf32>
    %173 = tpu.reciprocal %172 : vector<16x1xf32> -> vector<16x1xf32>
    %174 = vector.broadcast %162 : vector<16x1xf32> to vector<16x32xf32>
    %175 = arith.subf %158, %174 : vector<16x32xf32>
    %176 = vector.broadcast %32 : vector<1x32xf32> to vector<16x32xf32>
    %177 = arith.mulf %176, %175 : vector<16x32xf32>
    %178 = vector.broadcast %173 : vector<16x1xf32> to vector<16x32xf32>
    %179 = arith.mulf %177, %178 : vector<16x32xf32>
    %180 = vector.broadcast %34 : vector<1x32xf32> to vector<16x32xf32>
    %181 = arith.addf %179, %180 : vector<16x32xf32>
    %c1 = arith.constant 1 : index
    %c0_78 = arith.constant 0 : index
    %c0_79 = arith.constant 0 : index
    %182 = vector.load %arg3[%c1, %c0_78, %c0_79] : memref<2x32x96xf32, #tpu.memory_space<vmem>>, vector<1x32x96xf32>
    %183 = vector.shape_cast %182 : vector<1x32x96xf32> to vector<32x96xf32>
    %c1_80 = arith.constant 1 : index
    %c0_81 = arith.constant 0 : index
    %c0_82 = arith.constant 0 : index
    %184 = vector.load %arg4[%c1_80, %c0_81, %c0_82] : memref<2x1x96xf32, #tpu.memory_space<vmem>>, vector<1x1x96xf32>
    %185 = vector.shape_cast %184 : vector<1x1x96xf32> to vector<1x96xf32>
    %c1_83 = arith.constant 1 : index
    %c0_84 = arith.constant 0 : index
    %c0_85 = arith.constant 0 : index
    %186 = vector.load %arg5[%c1_83, %c0_84, %c0_85] : memref<2x32x32xf32, #tpu.memory_space<vmem>>, vector<1x32x32xf32>
    %187 = vector.shape_cast %186 : vector<1x32x32xf32> to vector<32x32xf32>
    %c1_86 = arith.constant 1 : index
    %c0_87 = arith.constant 0 : index
    %c0_88 = arith.constant 0 : index
    %188 = vector.load %arg6[%c1_86, %c0_87, %c0_88] : memref<2x1x32xf32, #tpu.memory_space<vmem>>, vector<1x1x32xf32>
    %189 = vector.shape_cast %188 : vector<1x1x32xf32> to vector<1x32xf32>
    %c1_89 = arith.constant 1 : index
    %c0_90 = arith.constant 0 : index
    %c0_91 = arith.constant 0 : index
    %190 = vector.load %arg7[%c1_89, %c0_90, %c0_91] : memref<2x32x64xf32, #tpu.memory_space<vmem>>, vector<1x32x64xf32>
    %191 = vector.shape_cast %190 : vector<1x32x64xf32> to vector<32x64xf32>
    %c1_92 = arith.constant 1 : index
    %c0_93 = arith.constant 0 : index
    %c0_94 = arith.constant 0 : index
    %192 = vector.load %arg8[%c1_92, %c0_93, %c0_94] : memref<2x1x64xf32, #tpu.memory_space<vmem>>, vector<1x1x64xf32>
    %193 = vector.shape_cast %192 : vector<1x1x64xf32> to vector<1x64xf32>
    %c1_95 = arith.constant 1 : index
    %c0_96 = arith.constant 0 : index
    %c0_97 = arith.constant 0 : index
    %194 = vector.load %arg9[%c1_95, %c0_96, %c0_97] : memref<2x64x32xf32, #tpu.memory_space<vmem>>, vector<1x64x32xf32>
    %195 = vector.shape_cast %194 : vector<1x64x32xf32> to vector<64x32xf32>
    %c1_98 = arith.constant 1 : index
    %c0_99 = arith.constant 0 : index
    %c0_100 = arith.constant 0 : index
    %196 = vector.load %arg10[%c1_98, %c0_99, %c0_100] : memref<2x1x32xf32, #tpu.memory_space<vmem>>, vector<1x1x32xf32>
    %197 = vector.shape_cast %196 : vector<1x1x32xf32> to vector<1x32xf32>
    %c1_101 = arith.constant 1 : index
    %c0_102 = arith.constant 0 : index
    %c0_103 = arith.constant 0 : index
    %198 = vector.load %arg11[%c1_101, %c0_102, %c0_103] : memref<2x1x32xf32, #tpu.memory_space<vmem>>, vector<1x1x32xf32>
    %199 = vector.shape_cast %198 : vector<1x1x32xf32> to vector<1x32xf32>
    %c1_104 = arith.constant 1 : index
    %c0_105 = arith.constant 0 : index
    %c0_106 = arith.constant 0 : index
    %200 = vector.load %arg12[%c1_104, %c0_105, %c0_106] : memref<2x1x32xf32, #tpu.memory_space<vmem>>, vector<1x1x32xf32>
    %201 = vector.shape_cast %200 : vector<1x1x32xf32> to vector<1x32xf32>
    %c1_107 = arith.constant 1 : index
    %c0_108 = arith.constant 0 : index
    %c0_109 = arith.constant 0 : index
    %202 = vector.load %arg13[%c1_107, %c0_108, %c0_109] : memref<2x1x32xf32, #tpu.memory_space<vmem>>, vector<1x1x32xf32>
    %203 = vector.shape_cast %202 : vector<1x1x32xf32> to vector<1x32xf32>
    %c1_110 = arith.constant 1 : index
    %c0_111 = arith.constant 0 : index
    %c0_112 = arith.constant 0 : index
    %204 = vector.load %arg14[%c1_110, %c0_111, %c0_112] : memref<2x1x32xf32, #tpu.memory_space<vmem>>, vector<1x1x32xf32>
    %205 = vector.shape_cast %204 : vector<1x1x32xf32> to vector<1x32xf32>
    %cst_113 = arith.constant dense<0.000000e+00> : vector<16x96xf32>
    %206 = tpu.matmul %181, %183, %cst_113 {dimension_numbers = #tpu.dot_dimension_numbers<[1], [0], [0], [1], [0, 0, 1, 1], [], []>} : vector<16x32xf32>, vector<32x96xf32>, vector<16x96xf32> -> vector<16x96xf32>
    %207 = vector.broadcast %185 : vector<1x96xf32> to vector<16x96xf32>
    %208 = arith.addf %206, %207 : vector<16x96xf32>
    %209 = vector.extract_strided_slice %208 {offsets = [0, 0], sizes = [16, 8], strides = [1, 1]} : vector<16x96xf32> to vector<16x8xf32>
    %210 = vector.shape_cast %209 : vector<16x8xf32> to vector<2x8x8xf32>
    %211 = vector.extract_strided_slice %208 {offsets = [0, 32], sizes = [16, 8], strides = [1, 1]} : vector<16x96xf32> to vector<16x8xf32>
    %212 = vector.shape_cast %211 : vector<16x8xf32> to vector<2x8x8xf32>
    %213 = vector.extract_strided_slice %208 {offsets = [0, 64], sizes = [16, 8], strides = [1, 1]} : vector<16x96xf32> to vector<16x8xf32>
    %214 = vector.shape_cast %213 : vector<16x8xf32> to vector<2x8x8xf32>
    "tpu.trace_start"() <{level = 10 : i32, message = "bqd,bkd->bqk"}> : () -> ()
    %cst_114 = arith.constant dense<0.000000e+00> : vector<2x8x8xf32>
    %215 = tpu.matmul %210, %212, %cst_114 {dimension_numbers = #tpu.dot_dimension_numbers<[2], [2], [1], [1], [0, 0, 0, 1, 1, 1], [0], [0]>} : vector<2x8x8xf32>, vector<2x8x8xf32>, vector<2x8x8xf32> -> vector<2x8x8xf32>
    "tpu.trace_stop"() : () -> ()
    %cst_115 = arith.constant 0.353553385 : f32
    %216 = vector.broadcast %cst_115 : f32 to vector<2x8x8xf32>
    %217 = arith.mulf %215, %216 : vector<2x8x8xf32>
    %cst_116 = arith.constant dense<0xFF800000> : vector<2x8xf32>
    %218 = vector.multi_reduction <maximumf>, %217, %cst_116 [2] : vector<2x8x8xf32> to vector<2x8xf32>
    %219 = vector.shape_cast %218 : vector<2x8xf32> to vector<2x8x1xf32>
    %220 = vector.broadcast %219 : vector<2x8x1xf32> to vector<2x8x8xf32>
    %221 = arith.subf %217, %220 : vector<2x8x8xf32>
    %222 = math.exp %221 : vector<2x8x8xf32>
    %cst_117 = arith.constant dense<0.000000e+00> : vector<2x8xf32>
    %223 = vector.multi_reduction <add>, %222, %cst_117 [2] : vector<2x8x8xf32> to vector<2x8xf32>
    %224 = vector.shape_cast %223 : vector<2x8xf32> to vector<2x8x1xf32>
    %225 = tpu.reciprocal %224 : vector<2x8x1xf32> -> vector<2x8x1xf32>
    %226 = vector.broadcast %225 : vector<2x8x1xf32> to vector<2x8x8xf32>
    %227 = arith.mulf %222, %226 : vector<2x8x8xf32>
    "tpu.trace_start"() <{level = 10 : i32, message = "bqk,bkd->bqd"}> : () -> ()
    %cst_118 = arith.constant dense<0.000000e+00> : vector<2x8x8xf32>
    %228 = tpu.matmul %227, %214, %cst_118 {dimension_numbers = #tpu.dot_dimension_numbers<[2], [1], [1], [2], [0, 0, 0, 1, 1, 2], [0], [0]>} : vector<2x8x8xf32>, vector<2x8x8xf32>, vector<2x8x8xf32> -> vector<2x8x8xf32>
    "tpu.trace_stop"() : () -> ()
    %229 = vector.shape_cast %228 : vector<2x8x8xf32> to vector<16x8xf32>
    %230 = vector.extract_strided_slice %208 {offsets = [0, 8], sizes = [16, 8], strides = [1, 1]} : vector<16x96xf32> to vector<16x8xf32>
    %231 = vector.shape_cast %230 : vector<16x8xf32> to vector<2x8x8xf32>
    %232 = vector.extract_strided_slice %208 {offsets = [0, 40], sizes = [16, 8], strides = [1, 1]} : vector<16x96xf32> to vector<16x8xf32>
    %233 = vector.shape_cast %232 : vector<16x8xf32> to vector<2x8x8xf32>
    %234 = vector.extract_strided_slice %208 {offsets = [0, 72], sizes = [16, 8], strides = [1, 1]} : vector<16x96xf32> to vector<16x8xf32>
    %235 = vector.shape_cast %234 : vector<16x8xf32> to vector<2x8x8xf32>
    "tpu.trace_start"() <{level = 10 : i32, message = "bqd,bkd->bqk"}> : () -> ()
    %cst_119 = arith.constant dense<0.000000e+00> : vector<2x8x8xf32>
    %236 = tpu.matmul %231, %233, %cst_119 {dimension_numbers = #tpu.dot_dimension_numbers<[2], [2], [1], [1], [0, 0, 0, 1, 1, 1], [0], [0]>} : vector<2x8x8xf32>, vector<2x8x8xf32>, vector<2x8x8xf32> -> vector<2x8x8xf32>
    "tpu.trace_stop"() : () -> ()
    %cst_120 = arith.constant 0.353553385 : f32
    %237 = vector.broadcast %cst_120 : f32 to vector<2x8x8xf32>
    %238 = arith.mulf %236, %237 : vector<2x8x8xf32>
    %cst_121 = arith.constant dense<0xFF800000> : vector<2x8xf32>
    %239 = vector.multi_reduction <maximumf>, %238, %cst_121 [2] : vector<2x8x8xf32> to vector<2x8xf32>
    %240 = vector.shape_cast %239 : vector<2x8xf32> to vector<2x8x1xf32>
    %241 = vector.broadcast %240 : vector<2x8x1xf32> to vector<2x8x8xf32>
    %242 = arith.subf %238, %241 : vector<2x8x8xf32>
    %243 = math.exp %242 : vector<2x8x8xf32>
    %cst_122 = arith.constant dense<0.000000e+00> : vector<2x8xf32>
    %244 = vector.multi_reduction <add>, %243, %cst_122 [2] : vector<2x8x8xf32> to vector<2x8xf32>
    %245 = vector.shape_cast %244 : vector<2x8xf32> to vector<2x8x1xf32>
    %246 = tpu.reciprocal %245 : vector<2x8x1xf32> -> vector<2x8x1xf32>
    %247 = vector.broadcast %246 : vector<2x8x1xf32> to vector<2x8x8xf32>
    %248 = arith.mulf %243, %247 : vector<2x8x8xf32>
    "tpu.trace_start"() <{level = 10 : i32, message = "bqk,bkd->bqd"}> : () -> ()
    %cst_123 = arith.constant dense<0.000000e+00> : vector<2x8x8xf32>
    %249 = tpu.matmul %248, %235, %cst_123 {dimension_numbers = #tpu.dot_dimension_numbers<[2], [1], [1], [2], [0, 0, 0, 1, 1, 2], [0], [0]>} : vector<2x8x8xf32>, vector<2x8x8xf32>, vector<2x8x8xf32> -> vector<2x8x8xf32>
    "tpu.trace_stop"() : () -> ()
    %250 = vector.shape_cast %249 : vector<2x8x8xf32> to vector<16x8xf32>
    %251 = vector.extract_strided_slice %208 {offsets = [0, 16], sizes = [16, 8], strides = [1, 1]} : vector<16x96xf32> to vector<16x8xf32>
    %252 = vector.shape_cast %251 : vector<16x8xf32> to vector<2x8x8xf32>
    %253 = vector.extract_strided_slice %208 {offsets = [0, 48], sizes = [16, 8], strides = [1, 1]} : vector<16x96xf32> to vector<16x8xf32>
    %254 = vector.shape_cast %253 : vector<16x8xf32> to vector<2x8x8xf32>
    %255 = vector.extract_strided_slice %208 {offsets = [0, 80], sizes = [16, 8], strides = [1, 1]} : vector<16x96xf32> to vector<16x8xf32>
    %256 = vector.shape_cast %255 : vector<16x8xf32> to vector<2x8x8xf32>
    "tpu.trace_start"() <{level = 10 : i32, message = "bqd,bkd->bqk"}> : () -> ()
    %cst_124 = arith.constant dense<0.000000e+00> : vector<2x8x8xf32>
    %257 = tpu.matmul %252, %254, %cst_124 {dimension_numbers = #tpu.dot_dimension_numbers<[2], [2], [1], [1], [0, 0, 0, 1, 1, 1], [0], [0]>} : vector<2x8x8xf32>, vector<2x8x8xf32>, vector<2x8x8xf32> -> vector<2x8x8xf32>
    "tpu.trace_stop"() : () -> ()
    %cst_125 = arith.constant 0.353553385 : f32
    %258 = vector.broadcast %cst_125 : f32 to vector<2x8x8xf32>
    %259 = arith.mulf %257, %258 : vector<2x8x8xf32>
    %cst_126 = arith.constant dense<0xFF800000> : vector<2x8xf32>
    %260 = vector.multi_reduction <maximumf>, %259, %cst_126 [2] : vector<2x8x8xf32> to vector<2x8xf32>
    %261 = vector.shape_cast %260 : vector<2x8xf32> to vector<2x8x1xf32>
    %262 = vector.broadcast %261 : vector<2x8x1xf32> to vector<2x8x8xf32>
    %263 = arith.subf %259, %262 : vector<2x8x8xf32>
    %264 = math.exp %263 : vector<2x8x8xf32>
    %cst_127 = arith.constant dense<0.000000e+00> : vector<2x8xf32>
    %265 = vector.multi_reduction <add>, %264, %cst_127 [2] : vector<2x8x8xf32> to vector<2x8xf32>
    %266 = vector.shape_cast %265 : vector<2x8xf32> to vector<2x8x1xf32>
    %267 = tpu.reciprocal %266 : vector<2x8x1xf32> -> vector<2x8x1xf32>
    %268 = vector.broadcast %267 : vector<2x8x1xf32> to vector<2x8x8xf32>
    %269 = arith.mulf %264, %268 : vector<2x8x8xf32>
    "tpu.trace_start"() <{level = 10 : i32, message = "bqk,bkd->bqd"}> : () -> ()
    %cst_128 = arith.constant dense<0.000000e+00> : vector<2x8x8xf32>
    %270 = tpu.matmul %269, %256, %cst_128 {dimension_numbers = #tpu.dot_dimension_numbers<[2], [1], [1], [2], [0, 0, 0, 1, 1, 2], [0], [0]>} : vector<2x8x8xf32>, vector<2x8x8xf32>, vector<2x8x8xf32> -> vector<2x8x8xf32>
    "tpu.trace_stop"() : () -> ()
    %271 = vector.shape_cast %270 : vector<2x8x8xf32> to vector<16x8xf32>
    %272 = vector.extract_strided_slice %208 {offsets = [0, 24], sizes = [16, 8], strides = [1, 1]} : vector<16x96xf32> to vector<16x8xf32>
    %273 = vector.shape_cast %272 : vector<16x8xf32> to vector<2x8x8xf32>
    %274 = vector.extract_strided_slice %208 {offsets = [0, 56], sizes = [16, 8], strides = [1, 1]} : vector<16x96xf32> to vector<16x8xf32>
    %275 = vector.shape_cast %274 : vector<16x8xf32> to vector<2x8x8xf32>
    %276 = vector.extract_strided_slice %208 {offsets = [0, 88], sizes = [16, 8], strides = [1, 1]} : vector<16x96xf32> to vector<16x8xf32>
    %277 = vector.shape_cast %276 : vector<16x8xf32> to vector<2x8x8xf32>
    "tpu.trace_start"() <{level = 10 : i32, message = "bqd,bkd->bqk"}> : () -> ()
    %cst_129 = arith.constant dense<0.000000e+00> : vector<2x8x8xf32>
    %278 = tpu.matmul %273, %275, %cst_129 {dimension_numbers = #tpu.dot_dimension_numbers<[2], [2], [1], [1], [0, 0, 0, 1, 1, 1], [0], [0]>} : vector<2x8x8xf32>, vector<2x8x8xf32>, vector<2x8x8xf32> -> vector<2x8x8xf32>
    "tpu.trace_stop"() : () -> ()
    %cst_130 = arith.constant 0.353553385 : f32
    %279 = vector.broadcast %cst_130 : f32 to vector<2x8x8xf32>
    %280 = arith.mulf %278, %279 : vector<2x8x8xf32>
    %cst_131 = arith.constant dense<0xFF800000> : vector<2x8xf32>
    %281 = vector.multi_reduction <maximumf>, %280, %cst_131 [2] : vector<2x8x8xf32> to vector<2x8xf32>
    %282 = vector.shape_cast %281 : vector<2x8xf32> to vector<2x8x1xf32>
    %283 = vector.broadcast %282 : vector<2x8x1xf32> to vector<2x8x8xf32>
    %284 = arith.subf %280, %283 : vector<2x8x8xf32>
    %285 = math.exp %284 : vector<2x8x8xf32>
    %cst_132 = arith.constant dense<0.000000e+00> : vector<2x8xf32>
    %286 = vector.multi_reduction <add>, %285, %cst_132 [2] : vector<2x8x8xf32> to vector<2x8xf32>
    %287 = vector.shape_cast %286 : vector<2x8xf32> to vector<2x8x1xf32>
    %288 = tpu.reciprocal %287 : vector<2x8x1xf32> -> vector<2x8x1xf32>
    %289 = vector.broadcast %288 : vector<2x8x1xf32> to vector<2x8x8xf32>
    %290 = arith.mulf %285, %289 : vector<2x8x8xf32>
    "tpu.trace_start"() <{level = 10 : i32, message = "bqk,bkd->bqd"}> : () -> ()
    %cst_133 = arith.constant dense<0.000000e+00> : vector<2x8x8xf32>
    %291 = tpu.matmul %290, %277, %cst_133 {dimension_numbers = #tpu.dot_dimension_numbers<[2], [1], [1], [2], [0, 0, 0, 1, 1, 2], [0], [0]>} : vector<2x8x8xf32>, vector<2x8x8xf32>, vector<2x8x8xf32> -> vector<2x8x8xf32>
    "tpu.trace_stop"() : () -> ()
    %292 = vector.shape_cast %291 : vector<2x8x8xf32> to vector<16x8xf32>
    %293 = tpu.concatenate %229, %250, %271, %292 in 1 : vector<16x8xf32>, vector<16x8xf32>, vector<16x8xf32>, vector<16x8xf32> -> vector<16x32xf32>
    %cst_134 = arith.constant dense<0.000000e+00> : vector<16x32xf32>
    %294 = tpu.matmul %293, %187, %cst_134 {dimension_numbers = #tpu.dot_dimension_numbers<[1], [0], [0], [1], [0, 0, 1, 1], [], []>} : vector<16x32xf32>, vector<32x32xf32>, vector<16x32xf32> -> vector<16x32xf32>
    %295 = vector.broadcast %189 : vector<1x32xf32> to vector<16x32xf32>
    %296 = arith.addf %294, %295 : vector<16x32xf32>
    %297 = arith.addf %181, %296 : vector<16x32xf32>
    %cst_135 = arith.constant dense<0.000000e+00> : vector<16xf32>
    %298 = vector.multi_reduction <add>, %297, %cst_135 [1] : vector<16x32xf32> to vector<16xf32>
    %299 = vector.shape_cast %298 : vector<16xf32> to vector<16x1xf32>
    %cst_136 = arith.constant 3.200000e+01 : f32
    %300 = vector.broadcast %cst_136 : f32 to vector<16x1xf32>
    %301 = arith.divf %299, %300 : vector<16x1xf32>
    %302 = vector.broadcast %301 : vector<16x1xf32> to vector<16x32xf32>
    %303 = arith.subf %297, %302 : vector<16x32xf32>
    %304 = arith.mulf %303, %303 : vector<16x32xf32>
    %cst_137 = arith.constant dense<0.000000e+00> : vector<16xf32>
    %305 = vector.multi_reduction <add>, %304, %cst_137 [1] : vector<16x32xf32> to vector<16xf32>
    %306 = vector.shape_cast %305 : vector<16xf32> to vector<16x1xf32>
    %cst_138 = arith.constant 3.100000e+01 : f32
    %307 = vector.broadcast %cst_138 : f32 to vector<16x1xf32>
    %308 = arith.divf %306, %307 : vector<16x1xf32>
    %309 = math.sqrt %308 : vector<16x1xf32>
    %cst_139 = arith.constant 9.99999997E-7 : f32
    %310 = vector.broadcast %cst_139 : f32 to vector<16x1xf32>
    %311 = arith.addf %309, %310 : vector<16x1xf32>
    %312 = tpu.reciprocal %311 : vector<16x1xf32> -> vector<16x1xf32>
    %313 = vector.broadcast %301 : vector<16x1xf32> to vector<16x32xf32>
    %314 = arith.subf %297, %313 : vector<16x32xf32>
    %315 = vector.broadcast %199 : vector<1x32xf32> to vector<16x32xf32>
    %316 = arith.mulf %315, %314 : vector<16x32xf32>
    %317 = vector.broadcast %312 : vector<16x1xf32> to vector<16x32xf32>
    %318 = arith.mulf %316, %317 : vector<16x32xf32>
    %319 = vector.broadcast %201 : vector<1x32xf32> to vector<16x32xf32>
    %320 = arith.addf %318, %319 : vector<16x32xf32>
    %cst_140 = arith.constant dense<0.000000e+00> : vector<16x64xf32>
    %321 = tpu.matmul %320, %191, %cst_140 {dimension_numbers = #tpu.dot_dimension_numbers<[1], [0], [0], [1], [0, 0, 1, 1], [], []>} : vector<16x32xf32>, vector<32x64xf32>, vector<16x64xf32> -> vector<16x64xf32>
    %322 = vector.broadcast %193 : vector<1x64xf32> to vector<16x64xf32>
    %323 = arith.addf %321, %322 : vector<16x64xf32>
    %cst_141 = arith.constant 0.000000e+00 : f32
    %324 = vector.broadcast %cst_141 : f32 to vector<16x64xf32>
    %325 = arith.maximumf %323, %324 : vector<16x64xf32>
    %cst_142 = arith.constant dense<0.000000e+00> : vector<16x32xf32>
    %326 = tpu.matmul %325, %195, %cst_142 {dimension_numbers = #tpu.dot_dimension_numbers<[1], [0], [0], [1], [0, 0, 1, 1], [], []>} : vector<16x64xf32>, vector<64x32xf32>, vector<16x32xf32> -> vector<16x32xf32>
    %327 = vector.broadcast %197 : vector<1x32xf32> to vector<16x32xf32>
    %328 = arith.addf %326, %327 : vector<16x32xf32>
    %329 = arith.addf %320, %328 : vector<16x32xf32>
    %cst_143 = arith.constant dense<0.000000e+00> : vector<16xf32>
    %330 = vector.multi_reduction <add>, %329, %cst_143 [1] : vector<16x32xf32> to vector<16xf32>
    %331 = vector.shape_cast %330 : vector<16xf32> to vector<16x1xf32>
    %cst_144 = arith.constant 3.200000e+01 : f32
    %332 = vector.broadcast %cst_144 : f32 to vector<16x1xf32>
    %333 = arith.divf %331, %332 : vector<16x1xf32>
    %334 = vector.broadcast %333 : vector<16x1xf32> to vector<16x32xf32>
    %335 = arith.subf %329, %334 : vector<16x32xf32>
    %336 = arith.mulf %335, %335 : vector<16x32xf32>
    %cst_145 = arith.constant dense<0.000000e+00> : vector<16xf32>
    %337 = vector.multi_reduction <add>, %336, %cst_145 [1] : vector<16x32xf32> to vector<16xf32>
    %338 = vector.shape_cast %337 : vector<16xf32> to vector<16x1xf32>
    %cst_146 = arith.constant 3.100000e+01 : f32
    %339 = vector.broadcast %cst_146 : f32 to vector<16x1xf32>
    %340 = arith.divf %338, %339 : vector<16x1xf32>
    %341 = math.sqrt %340 : vector<16x1xf32>
    %cst_147 = arith.constant 9.99999997E-7 : f32
    %342 = vector.broadcast %cst_147 : f32 to vector<16x1xf32>
    %343 = arith.addf %341, %342 : vector<16x1xf32>
    %344 = tpu.reciprocal %343 : vector<16x1xf32> -> vector<16x1xf32>
    %345 = vector.broadcast %333 : vector<16x1xf32> to vector<16x32xf32>
    %346 = arith.subf %329, %345 : vector<16x32xf32>
    %347 = vector.broadcast %203 : vector<1x32xf32> to vector<16x32xf32>
    %348 = arith.mulf %347, %346 : vector<16x32xf32>
    %349 = vector.broadcast %344 : vector<16x1xf32> to vector<16x32xf32>
    %350 = arith.mulf %348, %349 : vector<16x32xf32>
    %351 = vector.broadcast %205 : vector<1x32xf32> to vector<16x32xf32>
    %352 = arith.addf %350, %351 : vector<16x32xf32>
    %353 = vector.shape_cast %352 : vector<16x32xf32> to vector<2x8x32xf32>
    %c0_148 = arith.constant 0 : index
    %c0_149 = arith.constant 0 : index
    %c0_150 = arith.constant 0 : index
    %354 = vector.load %arg15[%c0_148, %c0_149, %c0_150] : memref<2x8x32xf32, #tpu.memory_space<vmem>>, vector<2x8x32xf32>
    tpu.vector_store %arg15[%c0_148, %c0_149, %c0_150], %353 {strides = array<i32>} : memref<2x8x32xf32, #tpu.memory_space<vmem>>, vector<2x8x32xf32>,
    return
  }
}

</mosaic_0001>

<bundles_post_ra>
// kernel: encoder_forward.1
= control target key start
LH: loop header
LB: loop body
LE: loop exit
PB: predicated region body
PF: predicated region fallthrough
CT: control target
= control target key end

     0   :  { %v4695_v2 = vmov 0   ;;  %s5410_s0 = inlined_call_operand.vmem [shape: s32[16,1], index: 0, kind: input, shape index: {}]   ;;  %s5411_s1 = inlined_call_operand.vmem [shape: f32[128,32], index: 1, kind: input, shape index: {}]   ;;  %s5412_s2 = inlined_call_operand.vmem [shape: f32[16,32], index: 2, kind: input, shape index: {}]   ;;  %s5413_s3 = inlined_call_operand.vmem [shape: f32[2,32,96], index: 3, kind: input, shape index: {}]   ;;  %s5414_s4 = inlined_call_operand.vmem [shape: f32[2,1,96], index: 4, kind: input, shape index: {}]   ;;  %s5415_s5 = inlined_call_operand.vmem [shape: f32[2,32,32], index: 5, kind: input, shape index: {}]   ;;  %s5416_s6 = inlined_call_operand.vmem [shape: f32[2,1,32], index: 6, kind: input, shape index: {}]   ;;  %s5417_s7 = inlined_call_operand.vmem [shape: f32[2,32,64], index: 7, kind: input, shape index: {}]   ;;  %s5418_s8 = inlined_call_operand.vmem [shape: f32[2,1,64], index: 8, kind: input, shape index: {}]   ;;  %s5419_s9 = inlined_call_operand.vmem [shape: f32[2,64,32], index: 9, kind: input, shape index: {}]   ;;  %s5420_s10 = inlined_call_operand.vmem [shape: f32[2,1,32], index: 10, kind: input, shape index: {}]   ;;  %s5421_s11 = inlined_call_operand.vmem [shape: f32[2,1,32], index: 11, kind: input, shape index: {}]   ;;  %s5422_s12 = inlined_call_operand.vmem [shape: f32[2,1,32], index: 12, kind: input, shape index: {}]   ;;  %s5423_s13 = inlined_call_operand.vmem [shape: f32[2,1,32], index: 13, kind: input, shape index: {}]   ;;  %s5424_s14 = inlined_call_operand.vmem [shape: f32[2,1,32], index: 14, kind: input, shape index: {}]   ;;  %s5425_s15 = inlined_call_operand.hbm [shape: f32[2,8,32], index: 15, kind: output, shape index: {}]  }
   0x1   :  { %v51_v0 = vld [vmem:[%s5410_s0] sm:$0xff]  ;;  %4574 = vset.pattern.permute.xlu0 %v4695_v2  ;;  %v66_v3 = vld [vmem:[%s5411_s1 + $0x8] sm:$0xff]  ;;  %v67_v4 = vld [vmem:[%s5411_s1 + $0x10] sm:$0xff] }
   0x2   :  { %v65_v1 = vld [vmem:[%s5411_s1] sm:$0xff]  ;;  %v68_v5 = vld [vmem:[%s5411_s1 + $0x18] sm:$0xff]  ;;  %56 = vperm.xlu0 %4574, %v51_v0   ;;  %v52_v8 = vld [vmem:[%s5410_s0 + $0x8] sm:$0xff] }
   0x3   :  { %v4442_v6 = vpack.c.bf16 %v66_v3, %v65_v1  ;;  %v4446_v7 = vpack.c.bf16 %v68_v5, %v67_v4  ;;  %v69_v9 = vld [vmem:[%s5411_s1 + $0x20] sm:$0xff]  ;;  %v70_v10 = vld [vmem:[%s5411_s1 + $0x28] sm:$0xff]  ;;  %v71_v12 = vld [vmem:[%s5411_s1 + $0x30] sm:$0xff] }
   0x4   :  { %v4450_v11 = vpack.c.bf16 %v70_v10, %v69_v9 }
   0x5   :  { %4443 = vmatprep.subr.bf16.mxu0 %v4442_v6 }
   0x6   :  { %4445 = vmatpush3.bf16.msra.mxu0 %v4442_v6  ;;  %59 = vperm.xlu0 %4574, %v52_v8  }
   0x7   :  { %4447 = vmatprep.subr.bf16.mxu0 %v4446_v7 }
   0x8   :  { %20 = vsyncpa [#allocation3], 0  ;;  %v72_v13 = vld [vmem:[%s5411_s1 + $0x38] sm:$0xff]  ;;  %v158_v14 = vld [vmem:[%s5413_s3] sm:$0xff]  ;;  %v53_v30 = vlaneseq  ;;  %v4696_v33 = vmov 1.0   ;;  %vm192_vm2 = vcmask 261120  }
   0x9   :  { %v159_v15 = vld [vmem:[%s5413_s3 + $0x8] sm:$0xff]  ;;  %v4454_v17 = vpack.c.bf16 %v72_v13, %v71_v12  ;;  %v73_v18 = vld [vmem:[%s5411_s1 + $0x40] sm:$0xff]  ;;  %v75_v21 = vld [vmem:[%s5411_s1 + $0x50] sm:$0xff]  ;;  %v4697_v44 = vmov 0.0   ;;  %vm4698_vm3 = vmmov 0   ;;  %s4699_s19 = smov 96  }
   0xa   :  { %v4474_v16 = vpack.c.bf16 %v159_v15, %v158_v14  ;;  %4449 = vmatpush3.bf16.msra.mxu0 %v4446_v7  ;;  %v74_v19 = vld [vmem:[%s5411_s1 + $0x48] sm:$0xff]  ;;  %v76_v22 = vld [vmem:[%s5411_s1 + $0x58] sm:$0xff]  ;;  %v77_v24 = vld [vmem:[%s5411_s1 + $0x60] sm:$0xff]  ;;  %v54_v31 = vand.u32 127, %v53_v30  ;;  %vm277_vm4 = vcmask 64512   ;;  %s4700_s20 = smov 64  }
   0xb   :  { %4451 = vmatprep.subr.bf16.mxu0 %v4450_v11  ;;  %v4458_v20 = vpack.c.bf16 %v74_v19, %v73_v18  ;;  %v4462_v23 = vpack.c.bf16 %v76_v22, %v75_v21  ;;  %v78_v25 = vld [vmem:[%s5411_s1 + $0x68] sm:$0xff]  ;;  %v79_v27 = vld [vmem:[%s5411_s1 + $0x70] sm:$0xff]  ;;  %v80_v28 = vld [vmem:[%s5411_s1 + $0x78] sm:$0xff]  ;;  %s4701_s21 = smov 88   ;;  %s4702_s0 = smov 120   ;;  %vm1630_vm5 = vcmask 195584  }
   0xc   :  { %4475 = vmatprep.subr.bf16.mxu1 %v4474_v16  ;;  %v4466_v26 = vpack.c.bf16 %v78_v25, %v77_v24  ;;  %v4470_v29 = vpack.c.bf16 %v80_v28, %v79_v27  ;;  %v160_v35 = vld [vmem:[%s5413_s3 + $0x10] sm:$0xff]  ;;  %v161_v36 = vld [vmem:[%s5413_s3 + $0x18] sm:$0xff]  ;;  %v81_v38 = vld [vmem:[%s5412_s2] sm:$0xff]  ;;  %s4703_s22 = smov 56   ;;  %s4704_s23 = smov 80   ;;  %vm1627_vm6 = vcmask 130048  }
   0xd   :  { %4477 = vmatpush3.bf16.msra.mxu1 %v4474_v16  ;;  %v4478_v37 = vpack.c.bf16 %v161_v36, %v160_v35  ;;  %v82_v39 = vld [vmem:[%s5412_s2 + $0x8] sm:$0xff]  ;;  %v3897_v45 = vld [vmem:[%s5414_s4] ss:$0 sm:$0xff]  ;;  %s4705_s24 = smov 112   ;;  %s4706_s25 = smov 48   ;;  %vm1875_vm11 = vcmask 523264  }
   0xe   :  { %4453 = vmatpush3.bf16.msra.mxu0 %v4450_v11  ;;  %s5436_s26 = smov 72   ;;  %s5434_s27 = smov 104  }
   0xf   :  { %4455 = vmatprep.subr.bf16.mxu0 %v4454_v17  ;;  %4479 = vmatprep.subr.bf16.mxu1 %v4478_v37  ;;  %s5430_s1 = smov 40   ;;  %s5428_s28 = smov 8  }
  0x10   :  { %s5426_s29 = smov 16   ;;  %s5432_s30 = smov 24  }
  0x11   :  { %4481 = vmatpush3.bf16.msra.mxu1 %v4478_v37  ;;  %s5443_s16 = smov 24  }
  0x12   :  { %4457 = vmatpush3.bf16.msra.mxu0 %v4454_v17  ;;  %4189 = vmatprep.subr.mxu1 %v4697_v44 }
  0x13   :  { %4459 = vmatprep.subr.bf16.mxu0 %v4458_v20 }
  0x16   :  { %4461 = vmatpush3.bf16.msra.mxu0 %v4458_v20 }
  0x17   :  { %4463 = vmatprep.subr.bf16.mxu0 %v4462_v23 }
  0x1a   :  { %4465 = vmatpush3.bf16.msra.mxu0 %v4462_v23 }
  0x1b   :  { %4467 = vmatprep.subr.bf16.mxu0 %v4466_v26 }
  0x1e   :  { %4469 = vmatpush3.bf16.msra.mxu0 %v4466_v26 }
  0x1f   :  { %4471 = vmatprep.subr.bf16.mxu0 %v4470_v29 }
  0x22   :  { %4473 = vmatpush3.bf16.msra.mxu0 %v4470_v29 }
  0x23   :  { %4219 = vmatprep.subr.mxu0 %v4697_v44 }
  0x81   :  { %v57_v32 = vpop.permute.xlu0 %56 }
  0x82   :  { %vm61_vm0 = vcmp.eq.s32.totalorder %v54_v31, %v57_v32 }
  0x83   :  { %4175 = vmatprep.mubr.msk.f32.mxu0 %vm61_vm0, %v4696_v33 }
  0x85   :  { %v60_v34 = vpop.permute.xlu0 %59 }
  0x86   :  { %vm62_vm1 = vcmp.eq.s32.totalorder %v54_v31, %v60_v34 }
  0x87   :  { %4176 = vmatmul.mubr.msk.f32.vlgmr.msra.gmra.mrb[0].mxu0 %vm62_vm1, %v4696_v33 }
  0x88   :  { %4221 = vmatprep.mubr.msk.f32.mxu0 %vm4698_vm3, %v4697_v44 }
 0x15a   :  { %v4177_v40 = vpop.f32.mrb[0].mxu0 }
 0x15b   :  { %v149_v41 = vpop.f32.mrb[1].mxu0  ;;  %v4869_v43 = vadd.f32 %v4177_v40, %v82_v39 }
 0x15c   :  { %v4867_v42 = vadd.f32 %v149_v41, %v81_v38 }
 0x15e   :  { %4186 = vmatprep.mubr.msk.f32.mxu1 %vm192_vm2, %v4867_v42 }
 0x15f   :  { %4187 = vmatmul.mubr.msk.f32.vlgmr.msra.gmra.mrb[0].mxu1 %vm192_vm2, %v4869_v43 }
 0x160   :  { %4191 = vmatprep.mubr.msk.f32.mxu1 %vm4698_vm3, %v4697_v44 }
 0x232   :  { %v4188_v46 = vpop.f32.mrb[0].mxu1 }
 0x233   :  { %v265_v47 = vpop.f32.mrb[1].mxu1  ;;  %v4888_v49 = vadd.f32 %v4188_v46, %v3897_v45 }
 0x234   :  { %v4884_v48 = vadd.f32 %v3897_v45, %v265_v47 }
 0x236   :  { %275 = vrot.lane.b32.xlu1 %v4884_v48, %s4699_s19 }
 0x23a   :  { %353 = vrot.lane.b32.xlu1 %v4888_v49, %s4699_s19 }
 0x2a8   :  { %v276_v50 = vpop.permute.xlu1 %275 }
 0x2a9   :  { %4190 = vmatpush3.xpose.msk.msra.mxu1 %vm277_vm4, %v276_v50 }
 0x2aa   :  { %4194 = vmatprep.subr.mxu1 %v4697_v44 }
 0x2ac   :  { %4192 = vmatmul.mubr.msk.f32.vlgmr.msra.gmra.mrb[2].mxu1 %vm277_vm4, %v4884_v48  ;;  %v354_v51 = vpop.permute.xlu1 %353 }
 0x2ad   :  { %4195 = vmatpush3.xpose.msk.msra.mxu1 %vm277_vm4, %v354_v51  ;;  %4196 = vmatprep.mubr.msk.f32.mxu1 %vm4698_vm3, %v4697_v44 }
 0x2ae   :  { %4199 = vmatprep.subr.mxu1 %v4697_v44 }
 0x2b0   :  { %4197 = vmatmul.mubr.msk.f32.vlgmr.msra.gmra.mrb[4].mxu1 %vm277_vm4, %v4888_v49 }
 0x2b1   :  { %4201 = vmatprep.mubr.msk.f32.mxu1 %vm4698_vm3, %v4697_v44 }
 0x37f   :  { %v348_v52 = vpop.f32.mrb[2].mxu1 }
 0x380   :  { %v429_v53 = vmul.f32 0.35355338, %v348_v52  ;;  %v4193_v54 = vpop.f32.mrb[3].mxu1 }
 0x382   :  { %v431_v55 = vsel %vm277_vm4, %v429_v53, -inf }
 0x383   :  { %432 = vmax.xlane.f32.xlu0 %v431_v55  ;;  %v425_v56 = vpop.f32.mrb[4].mxu1 }
 0x384   :  { %v430_v57 = vmul.f32 0.35355338, %v425_v56  ;;  %v4198_v58 = vpop.f32.mrb[5].mxu1 }
 0x386   :  { %v434_v59 = vsel %vm277_vm4, %v430_v57, -inf }
 0x387   :  { %435 = vmax.xlane.f32.xlu1 %v434_v59 }
 0x398   :  { %453 = vrot.lane.b32.xlu1 %v4884_v48, %s4700_s20 }
 0x39c   :  { %607 = vrot.lane.b32.xlu1 %v4884_v48, %s4701_s21 }
 0x3a0   :  { %605 = vrot.lane.b32.xlu1 %v4884_v48, %s4702_s0 }
 0x3a4   :  { %683 = vrot.lane.b32.xlu1 %v4888_v49, %s4702_s0 }
 0x410   :  { %v433_v60 = vpop.xlane.xlu0 %432 }
 0x411   :  { %v437_v61 = vsub.f32 %v429_v53, %v433_v60 }
 0x413   :  { %v439_v62 = vmul.f32 1.442695, %v437_v61 }
 0x414   :  { %v436_v63 = vpop.xlane.xlu1 %435 }
 0x415   :  { %4575 = vpow2.f32 %v439_v62  ;;  %v438_v0 = vsub.f32 %v430_v57, %v436_v63 }
 0x417   :  { %v441_v1 = vmul.f32 1.442695, %v438_v0 }
 0x418   :  { %v454_v2 = vpop.permute.xlu1 %453 }
 0x419   :  { %4577 = vpow2.f32 %v441_v1  ;;  %4200 = vmatpush3.msra.mxu1 %v454_v2 }
 0x41a   :  { %4204 = vmatprep.subr.mxu1 %v4697_v44 }
 0x41c   :  { %v608_v13 = vpop.permute.xlu1 %607 }
 0x41f   :  { %v4576_v3 = vpop.eup %4575 }
 0x420   :  { %v443_v4 = vsel %vm277_vm4, %v4576_v3, 0.0  ;;  %v606_v15 = vpop.permute.xlu1 %605 }
 0x421   :  { %444 = vadd.xlane.f32.xlu0 %v443_v4 }
 0x423   :  { %v4578_v5 = vpop.eup %4577 }
 0x424   :  { %v446_v6 = vsel %vm277_vm4, %v4578_v5, 0.0  ;;  %v684_v17 = vpop.permute.xlu1 %683 }
 0x425   :  { %447 = vadd.xlane.f32.xlu0 %v446_v6 }
 0x43b   :  { %529 = vrot.lane.b32.xlu0 %v4888_v49, %s4700_s20 }
 0x43f   :  { %685 = vrot.lane.b32.xlu0 %v4888_v49, %s4701_s21 }
 0x4ae   :  { %v445_v7 = vpop.xlane.xlu0 %444 }
 0x4af   :  { %4579 = vrcp.f32 %v445_v7 }
 0x4b2   :  { %v448_v8 = vpop.xlane.xlu0 %447 }
 0x4b3   :  { %4581 = vrcp.f32 %v448_v8 }
 0x4b6   :  { %v530_v11 = vpop.permute.xlu0 %529 }
 0x4b9   :  { %v4580_v9 = vpop.eup %4579 }
 0x4ba   :  { %v451_v10 = vmul.f32 %v4580_v9, %v4576_v3  ;;  %v686_v16 = vpop.permute.xlu0 %685 }
 0x4bc   :  { %4202 = vmatmul.mubr.msk.f32.vlgmr.msra.gmra.mrb[6].mxu1 %vm277_vm4, %v451_v10 }
 0x4bd   :  { %v4582_v12 = vpop.eup %4581  ;;  %4205 = vmatpush3.msra.mxu1 %v530_v11  ;;  %4206 = vmatprep.mubr.msk.f32.mxu1 %vm4698_vm3, %v4697_v44 }
 0x4be   :  { %v452_v14 = vmul.f32 %v4582_v12, %v4578_v5  ;;  %4209 = vmatprep.subr.mxu1 %v4697_v44 }
 0x4c0   :  { %4207 = vmatmul.mubr.msk.f32.vlgmr.msra.gmra.mrb[8].mxu1 %vm277_vm4, %v452_v14 }
 0x4c1   :  { %4211 = vmatprep.mubr.msk.f32.mxu1 %vm4698_vm3, %v4697_v44 }
 0x4c4   :  { %4210 = vmatpush3.xpose.msk.msra.mxu1 %vm277_vm4, %v608_v13 }
 0x4c5   :  { %4214 = vmatprep.subr.mxu1 %v4697_v44 }
 0x4c7   :  { %4212 = vmatmul.mubr.msk.f32.vlgmr.msra.gmra.mrb[10].mxu1 %vm277_vm4, %v606_v15 }
 0x4c8   :  { %4215 = vmatpush3.xpose.msk.msra.mxu1 %vm277_vm4, %v686_v16  ;;  %4216 = vmatprep.mubr.msk.f32.mxu1 %vm4698_vm3, %v4697_v44 }
 0x4c9   :  { %4224 = vmatprep.subr.mxu1 %v4697_v44 }
 0x4cb   :  { %4217 = vmatmul.mubr.msk.f32.vlgmr.msra.gmra.mrb[12].mxu1 %vm277_vm4, %v684_v17 }
 0x4cc   :  { %4226 = vmatprep.mubr.msk.f32.mxu1 %vm4698_vm3, %v4697_v44 }
 0x58f   :  { %v4938_v18 = vpop.f32.mrb[6].mxu1 }
 0x590   :  { %v4203_v19 = vpop.f32.mrb[7].mxu1 }
 0x593   :  { %v4940_v20 = vpop.f32.mrb[8].mxu1 }
 0x594   :  { %v4208_v21 = vpop.f32.mrb[9].mxu1 }
 0x59a   :  { %v679_v22 = vpop.f32.mrb[10].mxu1 }
 0x59b   :  { %v761_v23 = vmul.f32 0.35355338, %v679_v22  ;;  %v4213_v24 = vpop.f32.mrb[11].mxu1 }
 0x59d   :  { %v763_v25 = vsel %vm277_vm4, %v761_v23, -inf }
 0x59e   :  { %764 = vmax.xlane.f32.xlu0 %v763_v25  ;;  %v757_v26 = vpop.f32.mrb[12].mxu1 }
 0x59f   :  { %v762_v27 = vmul.f32 0.35355338, %v757_v26  ;;  %v4218_v28 = vpop.f32.mrb[13].mxu1 }
 0x5a1   :  { %v766_v29 = vsel %vm277_vm4, %v762_v27, -inf }
 0x5a2   :  { %767 = vmax.xlane.f32.xlu1 %v766_v29 }
 0x5b3   :  { %785 = vrot.lane.b32.xlu1 %v4884_v48, %s4703_s22 }
 0x5b4   :  { %861 = vrot.lane.b32.xlu0 %v4888_v49, %s4703_s22 }
 0x5b7   :  { %939 = vrot.lane.b32.xlu1 %v4884_v48, %s4704_s23 }
 0x5bb   :  { %1017 = vrot.lane.b32.xlu1 %v4888_v49, %s4704_s23 }
 0x5bf   :  { %1015 = vrot.lane.b32.xlu1 %v4888_v49, %s4705_s24 }
 0x62b   :  { %v765_v30 = vpop.xlane.xlu0 %764 }
 0x62c   :  { %v769_v31 = vsub.f32 %v761_v23, %v765_v30 }
 0x62e   :  { %v771_v32 = vmul.f32 1.442695, %v769_v31 }
 0x62f   :  { %v862_v33 = vpop.permute.xlu0 %861  ;;  %v768_v34 = vpop.xlane.xlu1 %767 }
 0x630   :  { %4583 = vpow2.f32 %v771_v32  ;;  %v770_v35 = vsub.f32 %v762_v27, %v768_v34  ;;  %4225 = vmatpush3.msra.mxu1 %v862_v33 }
 0x631   :  { %4234 = vmatprep.subr.mxu1 %v4697_v44 }
 0x632   :  { %v773_v36 = vmul.f32 1.442695, %v770_v35 }
 0x633   :  { %v786_v37 = vpop.permute.xlu1 %785 }
 0x634   :  { %4585 = vpow2.f32 %v773_v36  ;;  %4220 = vmatpush3.msra.mxu0 %v786_v37 }
 0x635   :  { %4229 = vmatprep.subr.mxu0 %v4697_v44 }
 0x637   :  { %v940_v47 = vpop.permute.xlu1 %939 }
 0x63a   :  { %v4584_v38 = vpop.eup %4583 }
 0x63b   :  { %v775_v39 = vsel %vm277_vm4, %v4584_v38, 0.0  ;;  %v1018_v53 = vpop.permute.xlu1 %1017 }
 0x63c   :  { %776 = vadd.xlane.f32.xlu0 %v775_v39 }
 0x63e   :  { %v4586_v40 = vpop.eup %4585 }
 0x63f   :  { %v778_v41 = vsel %vm277_vm4, %v4586_v40, 0.0  ;;  %v1016_v56 = vpop.permute.xlu1 %1015 }
 0x640   :  { %779 = vadd.xlane.f32.xlu0 %v778_v41 }
 0x656   :  { %937 = vrot.lane.b32.xlu0 %v4884_v48, %s4705_s24 }
 0x6c9   :  { %v777_v45 = vpop.xlane.xlu0 %776 }
 0x6ca   :  { %4587 = vrcp.f32 %v777_v45 }
 0x6cd   :  { %v780_v46 = vpop.xlane.xlu0 %779 }
 0x6ce   :  { %4589 = vrcp.f32 %v780_v46 }
 0x6d1   :  { %v938_v55 = vpop.permute.xlu0 %937 }
 0x6d4   :  { %v4588_v50 = vpop.eup %4587 }
 0x6d5   :  { %v783_v51 = vmul.f32 %v4588_v50, %v4584_v38 }
 0x6d7   :  { %4222 = vmatmul.mubr.msk.f32.vlgmr.msra.gmra.mrb[2].mxu0 %vm277_vm4, %v783_v51 }
 0x6d8   :  { %v4590_v52 = vpop.eup %4589  ;;  %4230 = vmatpush3.xpose.msk.msra.mxu0 %vm277_vm4, %v940_v47  ;;  %4231 = vmatprep.mubr.msk.f32.mxu0 %vm4698_vm3, %v4697_v44 }
 0x6d9   :  { %v784_v54 = vmul.f32 %v4590_v52, %v4586_v40  ;;  %4239 = vmatprep.subr.mxu0 %v4697_v44 }
 0x6db   :  { %4227 = vmatmul.mubr.msk.f32.vlgmr.msra.gmra.mrb[14].mxu1 %vm277_vm4, %v784_v54  ;;  %4232 = vmatmul.mubr.msk.f32.vlgmr.msra.gmra.mrb[4].mxu0 %vm277_vm4, %v938_v55 }
 0x6dc   :  { %4235 = vmatpush3.xpose.msk.msra.mxu1 %vm277_vm4, %v1018_v53  ;;  %4236 = vmatprep.mubr.msk.f32.mxu1 %vm4698_vm3, %v4697_v44 }
 0x6dd   :  { %4244 = vmatprep.subr.mxu1 %v4697_v44  ;;  %4241 = vmatprep.mubr.msk.f32.mxu0 %vm4698_vm3, %v4697_v44 }
 0x6df   :  { %4237 = vmatmul.mubr.msk.f32.vlgmr.msra.gmra.mrb[16].mxu1 %vm277_vm4, %v1016_v56 }
 0x6e0   :  { %4246 = vmatprep.mubr.msk.f32.mxu1 %vm4698_vm3, %v4697_v44 }
 0x7aa   :  { %v4976_v57 = vpop.f32.mrb[2].mxu0 }
 0x7ab   :  { %v4223_v58 = vpop.f32.mrb[3].mxu0 }
 0x7ae   :  { %v4978_v59 = vpop.f32.mrb[14].mxu1  ;;  %v1011_v60 = vpop.f32.mrb[4].mxu0 }
 0x7af   :  { %v1093_v61 = vmul.f32 0.35355338, %v1011_v60  ;;  %v4228_v62 = vpop.f32.mrb[15].mxu1  ;;  %v4233_v63 = vpop.f32.mrb[5].mxu0 }
 0x7b0   :  { %v164_v63 = vld [vmem:[%s5415_s5 + $0x8] sm:$0xff] }
 0x7b1   :  { %v1095_v0 = vsel %vm277_vm4, %v1093_v61, -inf }
 0x7b2   :  { %1096 = vmax.xlane.f32.xlu0 %v1095_v0  ;;  %v1089_v1 = vpop.f32.mrb[16].mxu1 }
 0x7b3   :  { %v1094_v2 = vmul.f32 0.35355338, %v1089_v1  ;;  %v4238_v3 = vpop.f32.mrb[17].mxu1  ;;  %v165_v1 = vld [vmem:[%s5415_s5 + $0x10] sm:$0xff] }
 0x7b5   :  { %v1098_v4 = vsel %vm277_vm4, %v1094_v2, -inf }
 0x7b6   :  { %1099 = vmax.xlane.f32.xlu1 %v1098_v4 }
 0x7c7   :  { %1117 = vrot.lane.b32.xlu1 %v4884_v48, %s4706_s25 }
 0x7c8   :  { %1193 = vrot.lane.b32.xlu0 %v4888_v49, %s4706_s25 }
 0x7cb   :  { %1271 = vrot.lane.b32.xlu1 %v4884_v48, %s5436_s26 }
 0x7cf   :  { %1349 = vrot.lane.b32.xlu1 %v4888_v49, %s5436_s26 }
 0x7d3   :  { %1347 = vrot.lane.b32.xlu1 %v4888_v49, %s5434_s27 }
 0x83f   :  { %v1097_v5 = vpop.xlane.xlu0 %1096 }
 0x840   :  { %v1101_v6 = vsub.f32 %v1093_v61, %v1097_v5 }
 0x842   :  { %v1103_v7 = vmul.f32 1.442695, %v1101_v6 }
 0x843   :  { %v1194_v8 = vpop.permute.xlu0 %1193  ;;  %v1100_v9 = vpop.xlane.xlu1 %1099 }
 0x844   :  { %4591 = vpow2.f32 %v1103_v7  ;;  %v1102_v10 = vsub.f32 %v1094_v2, %v1100_v9  ;;  %4245 = vmatpush3.msra.mxu1 %v1194_v8  ;;  %v166_v2 = vld [vmem:[%s5415_s5 + $0x18] sm:$0xff] }
 0x845   :  { %4254 = vmatprep.subr.mxu1 %v4697_v44  ;;  %v4486_v3 = vpack.c.bf16 %v166_v2, %v165_v1 }
 0x846   :  { %v1105_v11 = vmul.f32 1.442695, %v1102_v10 }
 0x847   :  { %v1118_v12 = vpop.permute.xlu1 %1117 }
 0x848   :  { %4593 = vpow2.f32 %v1105_v11  ;;  %4240 = vmatpush3.msra.mxu0 %v1118_v12 }
 0x849   :  { %4249 = vmatprep.subr.mxu0 %v4697_v44 }
 0x84b   :  { %v1272_v21 = vpop.permute.xlu1 %1271 }
 0x84e   :  { %v4592_v13 = vpop.eup %4591 }
 0x84f   :  { %v1107_v14 = vsel %vm277_vm4, %v4592_v13, 0.0  ;;  %v1350_v25 = vpop.permute.xlu1 %1349 }
 0x850   :  { %1108 = vadd.xlane.f32.xlu0 %v1107_v14 }
 0x852   :  { %v4594_v15 = vpop.eup %4593 }
 0x853   :  { %v1110_v16 = vsel %vm277_vm4, %v4594_v15, 0.0  ;;  %v1348_v28 = vpop.permute.xlu1 %1347 }
 0x854   :  { %1111 = vadd.xlane.f32.xlu0 %v1110_v16 }
 0x86a   :  { %1269 = vrot.lane.b32.xlu0 %v4884_v48, %s5434_s27 }
 0x8dd   :  { %v1109_v17 = vpop.xlane.xlu0 %1108 }
 0x8de   :  { %4595 = vrcp.f32 %v1109_v17 }
 0x8e1   :  { %v1112_v19 = vpop.xlane.xlu0 %1111 }
 0x8e2   :  { %4597 = vrcp.f32 %v1112_v19 }
 0x8e5   :  { %v1270_v27 = vpop.permute.xlu0 %1269 }
 0x8e8   :  { %v4596_v22 = vpop.eup %4595 }
 0x8e9   :  { %v1115_v23 = vmul.f32 %v4596_v22, %v4592_v13 }
 0x8eb   :  { %4242 = vmatmul.mubr.msk.f32.vlgmr.msra.gmra.mrb[6].mxu0 %vm277_vm4, %v1115_v23 }
 0x8ec   :  { %v4598_v24 = vpop.eup %4597  ;;  %4250 = vmatpush3.xpose.msk.msra.mxu0 %vm277_vm4, %v1272_v21  ;;  %4251 = vmatprep.mubr.msk.f32.mxu0 %vm4698_vm3, %v4697_v44 }
 0x8ed   :  { %v1116_v26 = vmul.f32 %v4598_v24, %v4594_v15  ;;  %4259 = vmatprep.subr.mxu0 %v4697_v44 }
 0x8ef   :  { %4247 = vmatmul.mubr.msk.f32.vlgmr.msra.gmra.mrb[18].mxu1 %vm277_vm4, %v1116_v26  ;;  %4252 = vmatmul.mubr.msk.f32.vlgmr.msra.gmra.mrb[8].mxu0 %vm277_vm4, %v1270_v27 }
 0x8f0   :  { %4255 = vmatpush3.xpose.msk.msra.mxu1 %vm277_vm4, %v1350_v25  ;;  %4256 = vmatprep.mubr.msk.f32.mxu1 %vm4698_vm3, %v4697_v44 }
 0x8f1   :  { %4264 = vmatprep.subr.mxu1 %v4697_v44  ;;  %4261 = vmatprep.mubr.msk.f32.mxu0 %vm4698_vm3, %v4697_v44 }
 0x8f3   :  { %4257 = vmatmul.mubr.msk.f32.vlgmr.msra.gmra.mrb[20].mxu1 %vm277_vm4, %v1348_v28 }
 0x8f4   :  { %4266 = vmatprep.mubr.msk.f32.mxu1 %vm4698_vm3, %v4697_v44 }
 0x9be   :  { %v1189_v29 = vpop.f32.mrb[6].mxu0 }
 0x9bf   :  { %v4243_v30 = vpop.f32.mrb[7].mxu0 }
 0x9c2   :  { %v1265_v31 = vpop.f32.mrb[18].mxu1  ;;  %v1343_v32 = vpop.f32.mrb[8].mxu0 }
 0x9c3   :  { %v1425_v33 = vmul.f32 0.35355338, %v1343_v32  ;;  %v4248_v34 = vpop.f32.mrb[19].mxu1  ;;  %v4253_v35 = vpop.f32.mrb[9].mxu0 }
 0x9c5   :  { %v1427_v36 = vsel %vm277_vm4, %v1425_v33, -inf }
 0x9c6   :  { %1428 = vmax.xlane.f32.xlu0 %v1427_v36  ;;  %v1421_v37 = vpop.f32.mrb[20].mxu1 }
 0x9c7   :  { %v1426_v38 = vmul.f32 0.35355338, %v1421_v37  ;;  %v4258_v39 = vpop.f32.mrb[21].mxu1 }
 0x9c8   :  { %v170_v39 = vld [vmem:[%s5417_s7 + $0x10] sm:$0xff] }
 0x9c9   :  { %v1430_v40 = vsel %vm277_vm4, %v1426_v38, -inf }
 0x9ca   :  { %1431 = vmax.xlane.f32.xlu1 %v1430_v40 }
 0x9db   :  { %1449 = vrot.lane.b32.xlu1 %v4884_v48, %s5430_s1 }
 0x9df   :  { %1603 = vrot.lane.b32.xlu1 %v4976_v57, %s5428_s28 }
 0x9e3   :  { %1605 = vrot.lane.b32.xlu1 %v4978_v59, %s5428_s28 }
 0x9e7   :  { %1613 = vrot.lane.b32.xlu1 %v1265_v31, %s5426_s29 }
 0xa53   :  { %v1429_v41 = vpop.xlane.xlu0 %1428 }
 0xa54   :  { %v1433_v45 = vsub.f32 %v1425_v33, %v1429_v41  ;;  %v171_v41 = vld [vmem:[%s5417_s7 + $0x18] sm:$0xff] }
 0xa56   :  { %v1435_v46 = vmul.f32 1.442695, %v1433_v45  ;;  %v4494_v45 = vpack.c.bf16 %v171_v41, %v170_v39 }
 0xa57   :  { %v1432_v47 = vpop.xlane.xlu1 %1431 }
 0xa58   :  { %4599 = vpow2.f32 %v1435_v46  ;;  %v1434_v50 = vsub.f32 %v1426_v38, %v1432_v47  ;;  %v169_v38 = vld [vmem:[%s5417_s7 + $0x8] sm:$0xff]  ;;  %v173_v46 = vld [vmem:[%s5419_s9] sm:$0xff] }
 0xa59   :  { %v174_v47 = vld [vmem:[%s5419_s9 + $0x8] sm:$0xff] }
 0xa5a   :  { %v1437_v51 = vmul.f32 1.442695, %v1434_v50  ;;  %v175_v50 = vld [vmem:[%s5419_s9 + $0x10] sm:$0xff] }
 0xa5b   :  { %v1450_v52 = vpop.permute.xlu1 %1449 }
 0xa5c   :  { %4601 = vpow2.f32 %v1437_v51  ;;  %4260 = vmatpush3.msra.mxu0 %v1450_v52  ;;  %v4498_v51 = vpack.c.bf16 %v174_v47, %v173_v46  ;;  %v176_v52 = vld [vmem:[%s5419_s9 + $0x18] sm:$0xff]  ;;  %v3937_v47 = vld [vmem:[%s5413_s3 + $0x20] sm:$0xff] }
 0xa5e   :  { %4499 = vmatprep.subr.bf16.mxu0 %v4498_v51 }
 0xa5f   :  { %v1604_v8 = vpop.permute.xlu1 %1603 }
 0xa60   :  { %v1625_v11 = vsel %vm277_vm4, %v4938_v18, %v1604_v8  ;;  %v3924_v18 = vld [vmem:[%s5416_s6] ss:$0 sm:$0xff] }
 0xa62   :  { %v4600_v48 = vpop.eup %4599 }
 0xa63   :  { %v1439_v53 = vsel %vm277_vm4, %v4600_v48, 0.0  ;;  %v1606_v9 = vpop.permute.xlu1 %1605 }
 0xa64   :  { %1440 = vadd.xlane.f32.xlu0 %v1439_v53  ;;  %v1626_v16 = vsel %vm277_vm4, %v4940_v20, %v1606_v9  ;;  %v177_v53 = vld [vmem:[%s5419_s9 + $0x20] sm:$0xff] }
 0xa66   :  { %v4602_v54 = vpop.eup %4601 }
 0xa67   :  { %v1442_v55 = vsel %vm277_vm4, %v4602_v54, 0.0  ;;  %v1614_v12 = vpop.permute.xlu1 %1613 }
 0xa68   :  { %1443 = vadd.xlane.f32.xlu0 %v1442_v55  ;;  %v1629_v17 = vsel %vm1627_vm6, %v1626_v16, %v1614_v12 }
 0xa7e   :  { %1525 = vrot.lane.b32.xlu0 %v4888_v49, %s5430_s1  ;;  %v163_v49 = vld [vmem:[%s5415_s5] sm:$0xff] }
 0xa7f   :  { %v4482_v0 = vpack.c.bf16 %v164_v63, %v163_v49 }
 0xa82   :  { %1611 = vrot.lane.b32.xlu0 %v1189_v29, %s5426_s29 }
 0xaf1   :  { %v1441_v56 = vpop.xlane.xlu0 %1440 }
 0xaf2   :  { %4603 = vrcp.f32 %v1441_v56 }
 0xaf5   :  { %v1444_v57 = vpop.xlane.xlu0 %1443 }
 0xaf6   :  { %4605 = vrcp.f32 %v1444_v57 }
 0xaf9   :  { %v1526_v58 = vpop.permute.xlu0 %1525 }
 0xafa   :  { %4265 = vmatpush3.msra.mxu1 %v1526_v58 }
 0xafb   :  { %4483 = vmatprep.subr.bf16.mxu1 %v4482_v0 }
 0xafc   :  { %v4604_v59 = vpop.eup %4603 }
 0xafd   :  { %v1447_v60 = vmul.f32 %v4604_v59, %v4600_v48  ;;  %v1612_v10 = vpop.permute.xlu0 %1611  ;;  %v4502_v48 = vpack.c.bf16 %v176_v52, %v175_v50  ;;  %v3938_v50 = vld [vmem:[%s5413_s3 + $0x28] sm:$0xff] }
 0xafe   :  { %v1628_v13 = vsel %vm1627_vm6, %v1625_v11, %v1612_v10  ;;  %v3928_v10 = vld [vmem:[%s5422_s12] ss:$0 sm:$0xff]  ;;  %v4514_v52 = vpack.c.bf16 %v3938_v50, %v3937_v47 }
 0xaff   :  { %4262 = vmatmul.mubr.msk.f32.vlgmr.msra.gmra.mrb[10].mxu0 %vm277_vm4, %v1447_v60 }
 0xb00   :  { %v4606_v61 = vpop.eup %4605  ;;  %4501 = vmatpush3.bf16.msra.mxu0 %v4498_v51  ;;  %v3939_v51 = vld [vmem:[%s5413_s3 + $0x30] sm:$0xff] }
 0xb01   :  { %v1448_v62 = vmul.f32 %v4606_v61, %v4602_v54  ;;  %v178_v54 = vld [vmem:[%s5419_s9 + $0x28] sm:$0xff]  ;;  %4503 = vmatprep.subr.bf16.mxu0 %v4502_v48 }
 0xb02   :  { %v4506_v55 = vpack.c.bf16 %v178_v54, %v177_v53 }
 0xb03   :  { %4267 = vmatmul.mubr.msk.f32.vlgmr.msra.gmra.mrb[22].mxu1 %vm277_vm4, %v1448_v62 }
 0xb04   :  { %4485 = vmatpush3.bf16.msra.mxu1 %v4482_v0  ;;  %4505 = vmatpush3.bf16.msra.mxu0 %v4502_v48  ;;  %v3940_v48 = vld [vmem:[%s5413_s3 + $0x38] sm:$0xff] }
 0xb05   :  { %4487 = vmatprep.subr.bf16.mxu1 %v4486_v3  ;;  %4507 = vmatprep.subr.bf16.mxu0 %v4506_v55  ;;  %v4518_v53 = vpack.c.bf16 %v3940_v48, %v3939_v51 }
 0xb08   :  { %4489 = vmatpush3.bf16.msra.mxu1 %v4486_v3  ;;  %4509 = vmatpush3.bf16.msra.mxu0 %v4506_v55 }
 0xbd2   :  { %v1521_v4 = vpop.f32.mrb[10].mxu0 }
 0xbd3   :  { %1619 = vrot.lane.b32.xlu0 %v1521_v4, %s5432_s30  ;;  %v4263_v5 = vpop.f32.mrb[11].mxu0 }
 0xbd6   :  { %v1597_v6 = vpop.f32.mrb[22].mxu1 }
 0xbd7   :  { %1621 = vrot.lane.b32.xlu1 %v1597_v6, %s5432_s30  ;;  %v4268_v7 = vpop.f32.mrb[23].mxu1 }
 0xbd8   :  { %v3927_v7 = vld [vmem:[%s5421_s11] ss:$0 sm:$0xff] }
 0xc45   :  { %v1620_v14 = vpop.permute.xlu0 %1619 }
 0xc46   :  { %v1631_v15 = vsel %vm1630_vm5, %v1628_v13, %v1620_v14 }
 0xc47   :  { %4277 = vmatprep.mubr.msk.f32.mxu1 %vm192_vm2, %v1631_v15 }
 0xc49   :  { %v1622_v19 = vpop.permute.xlu1 %1621 }
 0xc4a   :  { %v1632_v21 = vsel %vm1630_vm5, %v1629_v17, %v1622_v19  ;;  %v179_v17 = vld [vmem:[%s5419_s9 + $0x30] sm:$0xff]  ;;  %v180_v19 = vld [vmem:[%s5419_s9 + $0x38] sm:$0xff] }
 0xc4b   :  { %4278 = vmatmul.mubr.msk.f32.vlgmr.msra.gmra.mrb[24].mxu1 %vm192_vm2, %v1632_v21  ;;  %v4510_v21 = vpack.c.bf16 %v180_v19, %v179_v17 }
 0xc4d   :  { %4511 = vmatprep.subr.bf16.mxu0 %v4510_v21 }
 0xc4e   :  { %4513 = vmatpush3.bf16.msra.mxu0 %v4510_v21 }
 0xc4f   :  { %4331 = vmatprep.subr.mxu0 %v4697_v44 }
 0xd1e   :  { %v4279_v22 = vpop.f32.mrb[24].mxu1 }
 0xd1f   :  { %v1717_v23 = vadd.f32 %v4279_v22, %v3924_v18  ;;  %v1711_v24 = vpop.f32.mrb[25].mxu1 }
 0xd20   :  { %v1712_v25 = vadd.f32 %v3924_v18, %v1711_v24  ;;  %v3929_v18 = vld [vmem:[%s5418_s8] ss:$0 sm:$0xff] }
 0xd21   :  { %v1721_v26 = vadd.f32 %v1717_v23, %v4869_v43 }
 0xd22   :  { %v1720_v27 = vadd.f32 %v1712_v25, %v4867_v42  ;;  %v168_v42 = vld [vmem:[%s5417_s7] sm:$0xff] }
 0xd23   :  { %v1725_v20 = vsel %vm192_vm2, %v1721_v26, 0.0  ;;  %v4490_v40 = vpack.c.bf16 %v169_v38, %v168_v42 }
 0xd24   :  { %1726 = vadd.xlane.f32.xlu1 %v1725_v20  ;;  %v1722_v28 = vsel %vm192_vm2, %v1720_v27, 0.0  ;;  %v3932_v20 = vld [vmem:[%s5420_s10] ss:$0 sm:$0xff] }
 0xd25   :  { %1723 = vadd.xlane.f32.xlu0 %v1722_v28  ;;  %4491 = vmatprep.subr.bf16.mxu1 %v4490_v40 }
 0xd26   :  { %4493 = vmatpush3.bf16.msra.mxu1 %v4490_v40 }
 0xd27   :  { %4495 = vmatprep.subr.bf16.mxu1 %v4494_v45 }
 0xd2a   :  { %4497 = vmatpush3.bf16.msra.mxu1 %v4494_v45 }
 0xd2b   :  { %4515 = vmatprep.subr.bf16.mxu1 %v4514_v52 }
 0xdb1   :  { %v1727_v29 = vpop.xlane.xlu1 %1726 }
 0xdb2   :  { %v1730_v30 = vmul.f32 0.03125, %v1727_v29  ;;  %v1724_v31 = vpop.xlane.xlu0 %1723 }
 0xdb3   :  { %v1729_v32 = vmul.f32 0.03125, %v1724_v31 }
 0xdb4   :  { %v1732_v33 = vsub.f32 %v1721_v26, %v1730_v30 }
 0xdb5   :  { %v1731_v34 = vsub.f32 %v1720_v27, %v1729_v32 }
 0xdb6   :  { %v1734_v37 = vmul.f32 %v1732_v33, %v1732_v33  ;;  %v1769_v12 = vmul.f32 %v3927_v7, %v1732_v33 }
 0xdb7   :  { %v1733_v35 = vmul.f32 %v1731_v34, %v1731_v34  ;;  %v1768_v8 = vmul.f32 %v3927_v7, %v1731_v34 }
 0xdb8   :  { %v1738_v43 = vsel %vm192_vm2, %v1734_v37, 0.0 }
 0xdb9   :  { %v1735_v36 = vsel %vm192_vm2, %v1733_v35, 0.0 }
 0xdba   :  { %1736 = vadd.xlane.f32.xlu0 %v1735_v36 }
 0xdbe   :  { %1739 = vadd.xlane.f32.xlu0 %v1738_v43 }
 0xe47   :  { %v1737_v56 = vpop.xlane.xlu0 %1736 }
 0xe48   :  { %v1742_v57 = vmul.f32 0.032258064, %v1737_v56 }
 0xe4a   :  { %4607 = vrsqrt.f32 %v1742_v57  ;;  %vm1746_vm7 = vcmp.eq.f32.partialorder %v1742_v57, inf  ;;  %v1749_v62 = vand.u32 2147483648, %v1742_v57  ;;  %vm1748_vm8 = vcmp.eq.f32.partialorder %v1742_v57, 0.0 }
 0xe4b   :  { %v1740_v58 = vpop.xlane.xlu0 %1739 }
 0xe4c   :  { %v1743_v59 = vmul.f32 0.032258064, %v1740_v58 }
 0xe4e   :  { %4609 = vrsqrt.f32 %v1743_v59  ;;  %vm1753_vm9 = vcmp.eq.f32.partialorder %v1743_v59, inf  ;;  %v1756_v3 = vand.u32 2147483648, %v1743_v59  ;;  %vm1755_vm10 = vcmp.eq.f32.partialorder %v1743_v59, 0.0 }
 0xe54   :  { %v4608_v60 = vpop.eup %4607 }
 0xe55   :  { %v1745_v61 = vmul.f32 %v4608_v60, %v1742_v57 }
 0xe57   :  { %v1747_v49 = vsel %vm1746_vm7, %v1742_v57, %v1745_v61 }
 0xe58   :  { %v4610_v63 = vpop.eup %4609  ;;  %v1750_v0 = vsel %vm1748_vm8, %v1749_v62, %v1747_v49 }
 0xe59   :  { %v1752_v1 = vmul.f32 %v4610_v63, %v1743_v59  ;;  %v1758_v2 = vadd.f32 1e-06, %v1750_v0 }
 0xe5b   :  { %v1754_v4 = vsel %vm1753_vm9, %v1743_v59, %v1752_v1  ;;  %4611 = vrcp.f32 %v1758_v2 }
 0xe5c   :  { %v1757_v5 = vsel %vm1755_vm10, %v1756_v3, %v1754_v4 }
 0xe5d   :  { %v1759_v6 = vadd.f32 1e-06, %v1757_v5  ;;  %v3935_v5 = vld [vmem:[%s5423_s13] ss:$0 sm:$0xff] }
 0xe5f   :  { %4613 = vrcp.f32 %v1759_v6 }
 0xe65   :  { %v4612_v9 = vpop.eup %4611 }
 0xe66   :  { %v1770_v11 = vmul.f32 %v4612_v9, %v1768_v8 }
 0xe68   :  { %v1778_v13 = vadd.f32 %v3928_v10, %v1770_v11 }
 0xe69   :  { %v4614_v14 = vpop.eup %4613 }
 0xe6a   :  { %v1771_v15 = vmul.f32 %v4614_v14, %v1769_v12  ;;  %4288 = vmatprep.mubr.msk.f32.mxu1 %vm192_vm2, %v1778_v13 }
 0xe6c   :  { %v1779_v16 = vadd.f32 %v3928_v10, %v1771_v15  ;;  %v3936_v10 = vld [vmem:[%s5424_s14] ss:$0 sm:$0xff]  ;;  %v3965_v15 = vld [vmem:[%s5414_s4 + $0x1] ss:$0 sm:$0xff]  ;;  %s5438_s4 = smov 72  }
 0xe6e   :  { %4289 = vmatmul.mubr.msk.f32.vlgmr.msra.gmra.mrb[26].mxu1 %vm192_vm2, %v1779_v16 }
 0xe6f   :  { %4517 = vmatpush3.bf16.msra.mxu1 %v4514_v52 }
 0xe70   :  { %4519 = vmatprep.subr.bf16.mxu1 %v4518_v53 }
 0xe73   :  { %4521 = vmatpush3.bf16.msra.mxu1 %v4518_v53 }
 0xe74   :  { %4321 = vmatprep.subr.mxu1 %v4697_v44 }
 0xf41   :  { %v4290_v22 = vpop.f32.mrb[26].mxu1 }
 0xf42   :  { %v1864_v23 = vadd.f32 %v4290_v22, %v3929_v18  ;;  %v1858_v24 = vpop.f32.mrb[27].mxu1 }
 0xf43   :  { %v1859_v25 = vadd.f32 %v3929_v18, %v1858_v24 }
 0xf44   :  { %v1868_v27 = vmax.f32 %v1864_v23, 0.0 }
 0xf45   :  { %v1867_v26 = vmax.f32 %v1859_v25, 0.0 }
 0xf47   :  { %4307 = vmatprep.mubr.msk.f32.mxu0 %vm1875_vm11, %v1867_v26 }
 0xf48   :  { %4308 = vmatmul.mubr.msk.f32.vlgmr.msra.gmra.mrb[12].mxu0 %vm1875_vm11, %v1868_v27 }
 0xf49   :  { %4333 = vmatprep.mubr.msk.f32.mxu0 %vm4698_vm3, %v4697_v44 }
0x101b   :  { %v4309_v28 = vpop.f32.mrb[12].mxu0 }
0x101c   :  { %v1954_v29 = vadd.f32 %v4309_v28, %v3932_v20  ;;  %v1948_v30 = vpop.f32.mrb[13].mxu0 }
0x101d   :  { %v1949_v31 = vadd.f32 %v3932_v20, %v1948_v30 }
0x101e   :  { %v1958_v32 = vadd.f32 %v1954_v29, %v1779_v16 }
0x101f   :  { %v1957_v33 = vadd.f32 %v1949_v31, %v1778_v13 }
0x1020   :  { %v1962_v34 = vsel %vm192_vm2, %v1958_v32, 0.0 }
0x1021   :  { %1963 = vadd.xlane.f32.xlu0 %v1962_v34  ;;  %v1959_v35 = vsel %vm192_vm2, %v1957_v33, 0.0 }
0x1022   :  { %1960 = vadd.xlane.f32.xlu1 %v1959_v35 }
0x10ae   :  { %v1964_v36 = vpop.xlane.xlu0 %1963 }
0x10af   :  { %v1966_v37 = vmul.f32 0.03125, %v1964_v36  ;;  %v1961_v43 = vpop.xlane.xlu1 %1960 }
0x10b0   :  { %v1965_v42 = vmul.f32 0.03125, %v1961_v43 }
0x10b1   :  { %v1968_v38 = vsub.f32 %v1958_v32, %v1966_v37 }
0x10b2   :  { %v1967_v39 = vsub.f32 %v1957_v33, %v1965_v42 }
0x10b3   :  { %v1970_v40 = vmul.f32 %v1968_v38, %v1968_v38  ;;  %v2004_v6 = vmul.f32 %v3935_v5, %v1968_v38 }
0x10b4   :  { %v1969_v41 = vmul.f32 %v1967_v39, %v1967_v39  ;;  %v2003_v8 = vmul.f32 %v3935_v5, %v1967_v39 }
0x10b5   :  { %v1974_v45 = vsel %vm192_vm2, %v1970_v40, 0.0 }
0x10b6   :  { %1975 = vadd.xlane.f32.xlu0 %v1974_v45  ;;  %v1971_v46 = vsel %vm192_vm2, %v1969_v41, 0.0 }
0x10b7   :  { %1972 = vadd.xlane.f32.xlu1 %v1971_v46 }
0x1143   :  { %v1976_v54 = vpop.xlane.xlu0 %1975 }
0x1144   :  { %v1978_v55 = vmul.f32 0.032258064, %v1976_v54  ;;  %v1973_v56 = vpop.xlane.xlu1 %1972 }
0x1145   :  { %v1977_v57 = vmul.f32 0.032258064, %v1973_v56 }
0x1146   :  { %4615 = vrsqrt.f32 %v1978_v55  ;;  %vm1988_vm12 = vcmp.eq.f32.partialorder %v1978_v55, inf  ;;  %v1991_v61 = vand.u32 2147483648, %v1978_v55  ;;  %vm1990_vm13 = vcmp.eq.f32.partialorder %v1978_v55, 0.0 }
0x1147   :  { %4617 = vrsqrt.f32 %v1977_v57  ;;  %vm1981_vm14 = vcmp.eq.f32.partialorder %v1977_v57, inf  ;;  %v1984_v63 = vand.u32 2147483648, %v1977_v57  ;;  %vm1983_vm15 = vcmp.eq.f32.partialorder %v1977_v57, 0.0 }
0x1150   :  { %v4616_v58 = vpop.eup %4615 }
0x1151   :  { %v4618_v59 = vpop.eup %4617  ;;  %v1987_v60 = vmul.f32 %v4616_v58, %v1978_v55 }
0x1152   :  { %v1980_v62 = vmul.f32 %v4618_v59, %v1977_v57 }
0x1153   :  { %v1989_v49 = vsel %vm1988_vm12, %v1978_v55, %v1987_v60 }
0x1154   :  { %v1992_v0 = vsel %vm1990_vm13, %v1991_v61, %v1989_v49  ;;  %v1982_v1 = vsel %vm1981_vm14, %v1977_v57, %v1980_v62 }
0x1155   :  { %v1994_v2 = vadd.f32 1e-06, %v1992_v0  ;;  %v1985_v3 = vsel %vm1983_vm15, %v1984_v63, %v1982_v1 }
0x1156   :  { %v1993_v4 = vadd.f32 1e-06, %v1985_v3 }
0x1157   :  { %4619 = vrcp.f32 %v1994_v2 }
0x1158   :  { %4621 = vrcp.f32 %v1993_v4 }
0x1161   :  { %v4620_v7 = vpop.eup %4619 }
0x1162   :  { %v4622_v9 = vpop.eup %4621  ;;  %v2006_v11 = vmul.f32 %v4620_v7, %v2004_v6 }
0x1163   :  { %v2005_v12 = vmul.f32 %v4622_v9, %v2003_v8 }
0x1164   :  { %v5143_v14 = vadd.f32 %v3936_v10, %v2006_v11 }
0x1165   :  { %v5141_v13 = vadd.f32 %v3936_v10, %v2005_v12 }
0x1167   :  { %4318 = vmatprep.mubr.msk.f32.mxu1 %vm192_vm2, %v5141_v13 }
0x1168   :  { %4319 = vmatmul.mubr.msk.f32.vlgmr.msra.gmra.mrb[28].mxu1 %vm192_vm2, %v5143_v14 }
0x1169   :  { %4323 = vmatprep.mubr.msk.f32.mxu1 %vm4698_vm3, %v4697_v44 }
0x123b   :  { %v4320_v16 = vpop.f32.mrb[28].mxu1 }
0x123c   :  { %v5154_v17 = vadd.f32 %v4320_v16, %v3965_v15  ;;  %v2133_v19 = vpop.f32.mrb[29].mxu1 }
0x123d   :  { %v5156_v21 = vadd.f32 %v3965_v15, %v2133_v19 }
0x123e   :  { %2220 = vrot.lane.b32.xlu0 %v5154_v17, %s4699_s19 }
0x123f   :  { %2143 = vrot.lane.b32.xlu1 %v5156_v21, %s4699_s19  ;;  %s5439_s19 = smov 104  }
0x12b0   :  { %v2221_v22 = vpop.permute.xlu0 %2220 }
0x12b1   :  { %v2144_v18 = vpop.permute.xlu1 %2143 }
0x12b2   :  { %4322 = vmatpush3.xpose.msk.msra.mxu1 %vm277_vm4, %v2144_v18 }
0x12b3   :  { %4326 = vmatprep.subr.mxu1 %v4697_v44 }
0x12b5   :  { %4324 = vmatmul.mubr.msk.f32.vlgmr.msra.gmra.mrb[30].mxu1 %vm277_vm4, %v5156_v21 }
0x12b6   :  { %4327 = vmatpush3.xpose.msk.msra.mxu1 %vm277_vm4, %v2221_v22  ;;  %4328 = vmatprep.mubr.msk.f32.mxu1 %vm4698_vm3, %v4697_v44 }
0x12b7   :  { %4336 = vmatprep.subr.mxu1 %v4697_v44 }
0x12b9   :  { %4329 = vmatmul.mubr.msk.f32.vlgmr.msra.gmra.mrb[32].mxu1 %vm277_vm4, %v5154_v17 }
0x12ba   :  { %4338 = vmatprep.mubr.msk.f32.mxu1 %vm4698_vm3, %v4697_v44 }
0x1388   :  { %v2215_v23 = vpop.f32.mrb[30].mxu1 }
0x1389   :  { %v2296_v24 = vmul.f32 0.35355338, %v2215_v23  ;;  %v4325_v25 = vpop.f32.mrb[31].mxu1 }
0x138b   :  { %v2298_v26 = vsel %vm277_vm4, %v2296_v24, -inf }
0x138c   :  { %2299 = vmax.xlane.f32.xlu1 %v2298_v26  ;;  %v2292_v27 = vpop.f32.mrb[32].mxu1 }
0x138d   :  { %v2297_v20 = vmul.f32 0.35355338, %v2292_v27  ;;  %v4330_v28 = vpop.f32.mrb[33].mxu1 }
0x138f   :  { %v2301_v29 = vsel %vm277_vm4, %v2297_v20, -inf }
0x1390   :  { %2302 = vmax.xlane.f32.xlu0 %v2301_v29 }
0x139d   :  { %2320 = vrot.lane.b32.xlu1 %v5156_v21, %s4700_s20 }
0x13a1   :  { %2474 = vrot.lane.b32.xlu1 %v5156_v21, %s4701_s21 }
0x13a5   :  { %2552 = vrot.lane.b32.xlu1 %v5154_v17, %s4701_s21  ;;  %s5441_s21 = smov 8  }
0x13a6   :  { %2396 = vrot.lane.b32.xlu0 %v5154_v17, %s4700_s20  ;;  %s5440_s20 = smov 40  }
0x1419   :  { %v2300_v30 = vpop.xlane.xlu1 %2299 }
0x141a   :  { %v2304_v31 = vsub.f32 %v2296_v24, %v2300_v30 }
0x141c   :  { %v2306_v32 = vmul.f32 1.442695, %v2304_v31 }
0x141d   :  { %v2321_v33 = vpop.permute.xlu1 %2320  ;;  %v2303_v34 = vpop.xlane.xlu0 %2302 }
0x141e   :  { %4623 = vpow2.f32 %v2306_v32  ;;  %v2305_v35 = vsub.f32 %v2297_v20, %v2303_v34  ;;  %4332 = vmatpush3.msra.mxu0 %v2321_v33 }
0x141f   :  { %4341 = vmatprep.subr.mxu0 %v4697_v44 }
0x1420   :  { %v2308_v36 = vmul.f32 1.442695, %v2305_v35 }
0x1421   :  { %v2397_v37 = vpop.permute.xlu0 %2396  ;;  %v2475_v40 = vpop.permute.xlu1 %2474 }
0x1422   :  { %4625 = vpow2.f32 %v2308_v36  ;;  %4337 = vmatpush3.msra.mxu1 %v2397_v37 }
0x1423   :  { %4346 = vmatprep.subr.mxu1 %v4697_v44 }
0x1425   :  { %v2553_v41 = vpop.permute.xlu1 %2552 }
0x1428   :  { %v4624_v43 = vpop.eup %4623 }
0x1429   :  { %v2310_v42 = vsel %vm277_vm4, %v4624_v43, 0.0 }
0x142a   :  { %2311 = vadd.xlane.f32.xlu1 %v2310_v42 }
0x142c   :  { %v4626_v38 = vpop.eup %4625 }
0x142d   :  { %v2313_v39 = vsel %vm277_vm4, %v4626_v38, 0.0 }
0x142e   :  { %2314 = vadd.xlane.f32.xlu0 %v2313_v39 }
0x143b   :  { %2550 = vrot.lane.b32.xlu1 %v5154_v17, %s4702_s0 }
0x1444   :  { %2472 = vrot.lane.b32.xlu0 %v5156_v21, %s4702_s0  ;;  %s5442_s0 = smov 16  }
0x14b7   :  { %v2312_v45 = vpop.xlane.xlu1 %2311 }
0x14b8   :  { %4627 = vrcp.f32 %v2312_v45 }
0x14bb   :  { %v2315_v46 = vpop.xlane.xlu0 %2314  ;;  %v2551_v53 = vpop.permute.xlu1 %2550 }
0x14bc   :  { %4629 = vrcp.f32 %v2315_v46 }
0x14bf   :  { %v2473_v48 = vpop.permute.xlu0 %2472 }
0x14c2   :  { %v4628_v47 = vpop.eup %4627 }
0x14c3   :  { %v2318_v50 = vmul.f32 %v4628_v47, %v4624_v43 }
0x14c5   :  { %4334 = vmatmul.mubr.msk.f32.vlgmr.msra.gmra.mrb[14].mxu0 %vm277_vm4, %v2318_v50 }
0x14c6   :  { %v4630_v51 = vpop.eup %4629  ;;  %4342 = vmatpush3.xpose.msk.msra.mxu0 %vm277_vm4, %v2475_v40  ;;  %4343 = vmatprep.mubr.msk.f32.mxu0 %vm4698_vm3, %v4697_v44 }
0x14c7   :  { %v2319_v52 = vmul.f32 %v4630_v51, %v4626_v38  ;;  %4351 = vmatprep.subr.mxu0 %v4697_v44 }
0x14c9   :  { %4339 = vmatmul.mubr.msk.f32.vlgmr.msra.gmra.mrb[34].mxu1 %vm277_vm4, %v2319_v52  ;;  %4344 = vmatmul.mubr.msk.f32.vlgmr.msra.gmra.mrb[16].mxu0 %vm277_vm4, %v2473_v48 }
0x14ca   :  { %4347 = vmatpush3.xpose.msk.msra.mxu1 %vm277_vm4, %v2553_v41  ;;  %4348 = vmatprep.mubr.msk.f32.mxu1 %vm4698_vm3, %v4697_v44 }
0x14cb   :  { %4356 = vmatprep.subr.mxu1 %v4697_v44  ;;  %4353 = vmatprep.mubr.msk.f32.mxu0 %vm4698_vm3, %v4697_v44 }
0x14cd   :  { %4349 = vmatmul.mubr.msk.f32.vlgmr.msra.gmra.mrb[36].mxu1 %vm277_vm4, %v2551_v53 }
0x14ce   :  { %4358 = vmatprep.mubr.msk.f32.mxu1 %vm4698_vm3, %v4697_v44 }
0x1598   :  { %v5208_v54 = vpop.f32.mrb[14].mxu0 }
0x1599   :  { %v4335_v55 = vpop.f32.mrb[15].mxu0 }
0x159c   :  { %v5210_v56 = vpop.f32.mrb[34].mxu1  ;;  %v2546_v57 = vpop.f32.mrb[16].mxu0 }
0x159d   :  { %v2628_v58 = vmul.f32 0.35355338, %v2546_v57  ;;  %v4340_v59 = vpop.f32.mrb[35].mxu1  ;;  %v4345_v60 = vpop.f32.mrb[17].mxu0 }
0x159f   :  { %v2630_v61 = vsel %vm277_vm4, %v2628_v58, -inf }
0x15a0   :  { %2631 = vmax.xlane.f32.xlu0 %v2630_v61  ;;  %v2624_v62 = vpop.f32.mrb[36].mxu1 }
0x15a1   :  { %v2629_v49 = vmul.f32 0.35355338, %v2624_v62  ;;  %v4350_v63 = vpop.f32.mrb[37].mxu1 }
0x15a3   :  { %v2633_v0 = vsel %vm277_vm4, %v2629_v49, -inf }
0x15a4   :  { %2634 = vmax.xlane.f32.xlu1 %v2633_v0 }
0x15b5   :  { %2652 = vrot.lane.b32.xlu1 %v5156_v21, %s4703_s22 }
0x15b6   :  { %2728 = vrot.lane.b32.xlu0 %v5154_v17, %s4703_s22 }
0x15b9   :  { %2806 = vrot.lane.b32.xlu1 %v5156_v21, %s4704_s23 }
0x15bd   :  { %2884 = vrot.lane.b32.xlu1 %v5154_v17, %s4704_s23 }
0x15c1   :  { %2882 = vrot.lane.b32.xlu1 %v5154_v17, %s4705_s24 }
0x162d   :  { %v2632_v1 = vpop.xlane.xlu0 %2631 }
0x162e   :  { %v2636_v2 = vsub.f32 %v2628_v58, %v2632_v1 }
0x1630   :  { %v2638_v3 = vmul.f32 1.442695, %v2636_v2 }
0x1631   :  { %v2729_v4 = vpop.permute.xlu0 %2728  ;;  %v2635_v5 = vpop.xlane.xlu1 %2634 }
0x1632   :  { %4631 = vpow2.f32 %v2638_v3  ;;  %v2637_v6 = vsub.f32 %v2629_v49, %v2635_v5  ;;  %4357 = vmatpush3.msra.mxu1 %v2729_v4 }
0x1633   :  { %4366 = vmatprep.subr.mxu1 %v4697_v44 }
0x1634   :  { %v2640_v7 = vmul.f32 1.442695, %v2637_v6 }
0x1635   :  { %v2653_v8 = vpop.permute.xlu1 %2652 }
0x1636   :  { %4633 = vpow2.f32 %v2640_v7  ;;  %4352 = vmatpush3.msra.mxu0 %v2653_v8 }
0x1637   :  { %4361 = vmatprep.subr.mxu0 %v4697_v44 }
0x1639   :  { %v2807_v19 = vpop.permute.xlu1 %2806 }
0x163c   :  { %v4632_v9 = vpop.eup %4631 }
0x163d   :  { %v2642_v10 = vsel %vm277_vm4, %v4632_v9, 0.0  ;;  %v2885_v24 = vpop.permute.xlu1 %2884 }
0x163e   :  { %2643 = vadd.xlane.f32.xlu0 %v2642_v10 }
0x1640   :  { %v4634_v11 = vpop.eup %4633 }
0x1641   :  { %v2645_v12 = vsel %vm277_vm4, %v4634_v11, 0.0  ;;  %v2883_v27 = vpop.permute.xlu1 %2882 }
0x1642   :  { %2646 = vadd.xlane.f32.xlu0 %v2645_v12 }
0x1658   :  { %2804 = vrot.lane.b32.xlu0 %v5156_v21, %s4705_s24 }
0x16cb   :  { %v2644_v15 = vpop.xlane.xlu0 %2643 }
0x16cc   :  { %4635 = vrcp.f32 %v2644_v15 }
0x16cf   :  { %v2647_v16 = vpop.xlane.xlu0 %2646 }
0x16d0   :  { %4637 = vrcp.f32 %v2647_v16 }
0x16d3   :  { %v2805_v26 = vpop.permute.xlu0 %2804 }
0x16d6   :  { %v4636_v18 = vpop.eup %4635 }
0x16d7   :  { %v2650_v22 = vmul.f32 %v4636_v18, %v4632_v9 }
0x16d9   :  { %4354 = vmatmul.mubr.msk.f32.vlgmr.msra.gmra.mrb[18].mxu0 %vm277_vm4, %v2650_v22 }
0x16da   :  { %v4638_v23 = vpop.eup %4637  ;;  %4362 = vmatpush3.xpose.msk.msra.mxu0 %vm277_vm4, %v2807_v19  ;;  %4363 = vmatprep.mubr.msk.f32.mxu0 %vm4698_vm3, %v4697_v44 }
0x16db   :  { %v2651_v25 = vmul.f32 %v4638_v23, %v4634_v11  ;;  %4371 = vmatprep.subr.mxu0 %v4697_v44 }
0x16dd   :  { %4359 = vmatmul.mubr.msk.f32.vlgmr.msra.gmra.mrb[38].mxu1 %vm277_vm4, %v2651_v25  ;;  %4364 = vmatmul.mubr.msk.f32.vlgmr.msra.gmra.mrb[20].mxu0 %vm277_vm4, %v2805_v26 }
0x16de   :  { %4367 = vmatpush3.xpose.msk.msra.mxu1 %vm277_vm4, %v2885_v24  ;;  %4368 = vmatprep.mubr.msk.f32.mxu1 %vm4698_vm3, %v4697_v44 }
0x16df   :  { %4376 = vmatprep.subr.mxu1 %v4697_v44  ;;  %4373 = vmatprep.mubr.msk.f32.mxu0 %vm4698_vm3, %v4697_v44 }
0x16e1   :  { %4369 = vmatmul.mubr.msk.f32.vlgmr.msra.gmra.mrb[40].mxu1 %vm277_vm4, %v2883_v27 }
0x16e2   :  { %4378 = vmatprep.mubr.msk.f32.mxu1 %vm4698_vm3, %v4697_v44 }
0x17ac   :  { %v5246_v20 = vpop.f32.mrb[18].mxu0 }
0x17ad   :  { %v4355_v28 = vpop.f32.mrb[19].mxu0 }
0x17b0   :  { %v5248_v29 = vpop.f32.mrb[38].mxu1  ;;  %v2878_v30 = vpop.f32.mrb[20].mxu0 }
0x17b1   :  { %v2960_v31 = vmul.f32 0.35355338, %v2878_v30  ;;  %v4360_v32 = vpop.f32.mrb[39].mxu1  ;;  %v4365_v33 = vpop.f32.mrb[21].mxu0 }
0x17b2   :  { %v3943_v32 = vld [vmem:[%s5415_s5 + $0x28] sm:$0xff] }
0x17b3   :  { %v2962_v34 = vsel %vm277_vm4, %v2960_v31, -inf }
0x17b4   :  { %2963 = vmax.xlane.f32.xlu0 %v2962_v34  ;;  %v2956_v35 = vpop.f32.mrb[40].mxu1  ;;  %v3944_v34 = vld [vmem:[%s5415_s5 + $0x30] sm:$0xff] }
0x17b5   :  { %v2961_v36 = vmul.f32 0.35355338, %v2956_v35  ;;  %v4370_v37 = vpop.f32.mrb[41].mxu1  ;;  %v3945_v35 = vld [vmem:[%s5415_s5 + $0x38] sm:$0xff] }
0x17b7   :  { %v2965_v43 = vsel %vm277_vm4, %v2961_v36, -inf }
0x17b8   :  { %2966 = vmax.xlane.f32.xlu1 %v2965_v43 }
0x17c9   :  { %2984 = vrot.lane.b32.xlu1 %v5156_v21, %s4706_s25 }
0x17ca   :  { %3060 = vrot.lane.b32.xlu0 %v5154_v17, %s4706_s25 }
0x17cd   :  { %3138 = vrot.lane.b32.xlu1 %v5156_v21, %s5438_s4 }
0x17d1   :  { %3216 = vrot.lane.b32.xlu1 %v5154_v17, %s5438_s4 }
0x17d5   :  { %3214 = vrot.lane.b32.xlu1 %v5154_v17, %s5439_s19 }
0x1841   :  { %v2964_v42 = vpop.xlane.xlu0 %2963 }
0x1842   :  { %v2968_v38 = vsub.f32 %v2960_v31, %v2964_v42 }
0x1844   :  { %v2970_v39 = vmul.f32 1.442695, %v2968_v38 }
0x1845   :  { %v3061_v40 = vpop.permute.xlu0 %3060  ;;  %v2967_v41 = vpop.xlane.xlu1 %2966 }
0x1846   :  { %4639 = vpow2.f32 %v2970_v39  ;;  %v2969_v45 = vsub.f32 %v2961_v36, %v2967_v41  ;;  %4377 = vmatpush3.msra.mxu1 %v3061_v40  ;;  %v4526_v36 = vpack.c.bf16 %v3945_v35, %v3944_v34 }
0x1847   :  { %4386 = vmatprep.subr.mxu1 %v4697_v44 }
0x1848   :  { %v2972_v46 = vmul.f32 1.442695, %v2969_v45 }
0x1849   :  { %v2985_v47 = vpop.permute.xlu1 %2984 }
0x184a   :  { %4641 = vpow2.f32 %v2972_v46  ;;  %4372 = vmatpush3.msra.mxu0 %v2985_v47 }
0x184b   :  { %4381 = vmatprep.subr.mxu0 %v4697_v44 }
0x184d   :  { %v3139_v57 = vpop.permute.xlu1 %3138 }
0x1850   :  { %v4640_v50 = vpop.eup %4639 }
0x1851   :  { %v2974_v51 = vsel %vm277_vm4, %v4640_v50, 0.0  ;;  %v3217_v61 = vpop.permute.xlu1 %3216 }
0x1852   :  { %2975 = vadd.xlane.f32.xlu0 %v2974_v51 }
0x1854   :  { %v4642_v52 = vpop.eup %4641 }
0x1855   :  { %v2977_v48 = vsel %vm277_vm4, %v4642_v52, 0.0  ;;  %v3215_v63 = vpop.permute.xlu1 %3214 }
0x1856   :  { %2978 = vadd.xlane.f32.xlu0 %v2977_v48 }
0x186c   :  { %3136 = vrot.lane.b32.xlu0 %v5156_v21, %s5439_s19 }
0x18df   :  { %v2976_v53 = vpop.xlane.xlu0 %2975 }
0x18e0   :  { %4643 = vrcp.f32 %v2976_v53 }
0x18e3   :  { %v2979_v55 = vpop.xlane.xlu0 %2978 }
0x18e4   :  { %4645 = vrcp.f32 %v2979_v55 }
0x18e7   :  { %v3137_v49 = vpop.permute.xlu0 %3136 }
0x18ea   :  { %v4644_v58 = vpop.eup %4643 }
0x18eb   :  { %v2982_v59 = vmul.f32 %v4644_v58, %v4640_v50 }
0x18ed   :  { %4374 = vmatmul.mubr.msk.f32.vlgmr.msra.gmra.mrb[22].mxu0 %vm277_vm4, %v2982_v59 }
0x18ee   :  { %v4646_v60 = vpop.eup %4645  ;;  %4382 = vmatpush3.xpose.msk.msra.mxu0 %vm277_vm4, %v3139_v57  ;;  %4383 = vmatprep.mubr.msk.f32.mxu0 %vm4698_vm3, %v4697_v44 }
0x18ef   :  { %v2983_v62 = vmul.f32 %v4646_v60, %v4642_v52  ;;  %4391 = vmatprep.subr.mxu0 %v4697_v44 }
0x18f1   :  { %4379 = vmatmul.mubr.msk.f32.vlgmr.msra.gmra.mrb[42].mxu1 %vm277_vm4, %v2983_v62  ;;  %4384 = vmatmul.mubr.msk.f32.vlgmr.msra.gmra.mrb[24].mxu0 %vm277_vm4, %v3137_v49 }
0x18f2   :  { %4387 = vmatpush3.xpose.msk.msra.mxu1 %vm277_vm4, %v3217_v61  ;;  %4388 = vmatprep.mubr.msk.f32.mxu1 %vm4698_vm3, %v4697_v44 }
0x18f3   :  { %4396 = vmatprep.subr.mxu1 %v4697_v44  ;;  %4393 = vmatprep.mubr.msk.f32.mxu0 %vm4698_vm3, %v4697_v44 }
0x18f5   :  { %4389 = vmatmul.mubr.msk.f32.vlgmr.msra.gmra.mrb[44].mxu1 %vm277_vm4, %v3215_v63 }
0x18f6   :  { %4398 = vmatprep.mubr.msk.f32.mxu1 %vm4698_vm3, %v4697_v44 }
0x19c0   :  { %v3056_v0 = vpop.f32.mrb[22].mxu0 }
0x19c1   :  { %v4375_v1 = vpop.f32.mrb[23].mxu0 }
0x19c4   :  { %v3132_v2 = vpop.f32.mrb[42].mxu1  ;;  %v3210_v3 = vpop.f32.mrb[24].mxu0 }
0x19c5   :  { %v3292_v4 = vmul.f32 0.35355338, %v3210_v3  ;;  %v4380_v5 = vpop.f32.mrb[43].mxu1  ;;  %v4385_v6 = vpop.f32.mrb[25].mxu0 }
0x19c7   :  { %v3294_v7 = vsel %vm277_vm4, %v3292_v4, -inf }
0x19c8   :  { %3295 = vmax.xlane.f32.xlu0 %v3294_v7  ;;  %v3288_v8 = vpop.f32.mrb[44].mxu1 }
0x19c9   :  { %v3293_v9 = vmul.f32 0.35355338, %v3288_v8  ;;  %v4390_v10 = vpop.f32.mrb[45].mxu1  ;;  %v3948_v8 = vld [vmem:[%s5417_s7 + $0x28] sm:$0xff] }
0x19cb   :  { %v3297_v11 = vsel %vm277_vm4, %v3293_v9, -inf }
0x19cc   :  { %3298 = vmax.xlane.f32.xlu1 %v3297_v11  ;;  %v3950_v11 = vld [vmem:[%s5417_s7 + $0x38] sm:$0xff] }
0x19dd   :  { %3316 = vrot.lane.b32.xlu1 %v5156_v21, %s5440_s20 }
0x19e1   :  { %3470 = vrot.lane.b32.xlu1 %v5246_v20, %s5441_s21 }
0x19e5   :  { %3472 = vrot.lane.b32.xlu1 %v5248_v29, %s5441_s21 }
0x19e9   :  { %3480 = vrot.lane.b32.xlu1 %v3132_v2, %s5442_s0 }
0x1a55   :  { %v3296_v44 = vpop.xlane.xlu0 %3295 }
0x1a56   :  { %v3300_v12 = vsub.f32 %v3292_v4, %v3296_v44 }
0x1a58   :  { %v3302_v15 = vmul.f32 1.442695, %v3300_v12  ;;  %v3952_v12 = vld [vmem:[%s5419_s9 + $0x40] sm:$0xff] }
0x1a59   :  { %v3299_v16 = vpop.xlane.xlu1 %3298 }
0x1a5a   :  { %4647 = vpow2.f32 %v3302_v15  ;;  %v3301_v19 = vsub.f32 %v3293_v9, %v3299_v16  ;;  %v3949_v9 = vld [vmem:[%s5417_s7 + $0x30] sm:$0xff]  ;;  %v3953_v15 = vld [vmem:[%s5419_s9 + $0x48] sm:$0xff] }
0x1a5b   :  { %v4534_v44 = vpack.c.bf16 %v3950_v11, %v3949_v9  ;;  %v3954_v16 = vld [vmem:[%s5419_s9 + $0x50] sm:$0xff] }
0x1a5c   :  { %v3304_v18 = vmul.f32 1.442695, %v3301_v19  ;;  %v4538_v19 = vpack.c.bf16 %v3953_v15, %v3952_v12 }
0x1a5d   :  { %v3317_v22 = vpop.permute.xlu1 %3316 }
0x1a5e   :  { %4649 = vpow2.f32 %v3304_v18  ;;  %4392 = vmatpush3.msra.mxu0 %v3317_v22  ;;  %v3955_v18 = vld [vmem:[%s5419_s9 + $0x58] sm:$0xff] }
0x1a5f   :  { %v4542_v22 = vpack.c.bf16 %v3955_v18, %v3954_v16 }
0x1a61   :  { %v3471_v39 = vpop.permute.xlu1 %3470 }
0x1a62   :  { %v3492_v45 = vsel %vm277_vm4, %v5208_v54, %v3471_v39  ;;  %v3992_v54 = vld [vmem:[%s5416_s6 + $0x1] ss:$0 sm:$0xff] }
0x1a64   :  { %v4648_v23 = vpop.eup %4647 }
0x1a65   :  { %v3306_v21 = vsel %vm277_vm4, %v4648_v23, 0.0  ;;  %v3473_v40 = vpop.permute.xlu1 %3472 }
0x1a66   :  { %3307 = vadd.xlane.f32.xlu0 %v3306_v21  ;;  %v3493_v52 = vsel %vm277_vm4, %v5210_v56, %v3473_v40  ;;  %v3957_v21 = vld [vmem:[%s5419_s9 + $0x68] sm:$0xff]  ;;  %v3996_v40 = vld [vmem:[%s5422_s12 + $0x1] ss:$0 sm:$0xff] }
0x1a68   :  { %v4650_v24 = vpop.eup %4649 }
0x1a69   :  { %v3309_v25 = vsel %vm277_vm4, %v4650_v24, 0.0  ;;  %v3481_v46 = vpop.permute.xlu1 %3480 }
0x1a6a   :  { %3310 = vadd.xlane.f32.xlu0 %v3309_v25  ;;  %v3495_v48 = vsel %vm1627_vm6, %v3493_v52, %v3481_v46  ;;  %v3958_v52 = vld [vmem:[%s5419_s9 + $0x70] sm:$0xff] }
0x1a80   :  { %3392 = vrot.lane.b32.xlu0 %v5154_v17, %s5440_s20  ;;  %v3942_v17 = vld [vmem:[%s5415_s5 + $0x20] sm:$0xff] }
0x1a81   :  { %v4522_v33 = vpack.c.bf16 %v3943_v32, %v3942_v17 }
0x1a83   :  { %4523 = vmatprep.subr.bf16.mxu0 %v4522_v33 }
0x1a84   :  { %3478 = vrot.lane.b32.xlu0 %v3056_v0, %s5442_s0  ;;  %s4713_s0 = smov [#allocation2]  }
0x1a85   :  { %s3884_s22 = sshll.u32 %s4713_s0, 4  ;;  %s3885_s22 = int_to_ptr.vmem [resolvable:$true] %s3884_s22 }
0x1a86   :  { %p4676_p1 = scmp.lt.s32.totalorder %s3885_s22, %s3885_s22 }
0x1af3   :  { %v3308_v26 = vpop.xlane.xlu0 %3307 }
0x1af4   :  { %4651 = vrcp.f32 %v3308_v26 }
0x1af7   :  { %v3311_v27 = vpop.xlane.xlu0 %3310 }
0x1af8   :  { %4653 = vrcp.f32 %v3311_v27 }
0x1afb   :  { %v3393_v20 = vpop.permute.xlu0 %3392 }
0x1afc   :  { %4397 = vmatpush3.msra.mxu1 %v3393_v20 }
0x1afe   :  { %v4652_v28 = vpop.eup %4651 }
0x1aff   :  { %v3314_v29 = vmul.f32 %v4652_v28, %v4648_v23  ;;  %v3479_v41 = vpop.permute.xlu0 %3478  ;;  %v3956_v23 = vld [vmem:[%s5419_s9 + $0x60] sm:$0xff] }
0x1b00   :  { %v3494_v47 = vsel %vm1627_vm6, %v3492_v45, %v3479_v41 }
0x1b01   :  { %4394 = vmatmul.mubr.msk.f32.vlgmr.msra.gmra.mrb[26].mxu0 %vm277_vm4, %v3314_v29 }
0x1b02   :  { %v4654_v30 = vpop.eup %4653  ;;  %4525 = vmatpush3.bf16.msra.mxu0 %v4522_v33 }
0x1b03   :  { %v3315_v31 = vmul.f32 %v4654_v30, %v4650_v24  ;;  %4527 = vmatprep.subr.bf16.mxu0 %v4526_v36  ;;  %v4546_v24 = vpack.c.bf16 %v3957_v21, %v3956_v23 }
0x1b05   :  { %4399 = vmatmul.mubr.msk.f32.vlgmr.msra.gmra.mrb[46].mxu1 %vm277_vm4, %v3315_v31 }
0x1b06   :  { %4529 = vmatpush3.bf16.msra.mxu0 %v4526_v36 }
0x1b07   :  { %4539 = vmatprep.subr.bf16.mxu0 %v4538_v19 }
0x1bd4   :  { %v3388_v37 = vpop.f32.mrb[26].mxu0 }
0x1bd5   :  { %3486 = vrot.lane.b32.xlu0 %v3388_v37, %s5443_s16  ;;  %v4395_v43 = vpop.f32.mrb[27].mxu0 }
0x1bd8   :  { %v3464_v42 = vpop.f32.mrb[46].mxu1 }
0x1bd9   :  { %3488 = vrot.lane.b32.xlu1 %v3464_v42, %s5443_s16  ;;  %v4400_v38 = vpop.f32.mrb[47].mxu1  ;;  %v3995_v42 = vld [vmem:[%s5421_s11 + $0x1] ss:$0 sm:$0xff] }
0x1c47   :  { %v3487_v50 = vpop.permute.xlu0 %3486 }
0x1c48   :  { %v3496_v51 = vsel %vm1630_vm5, %v3494_v47, %v3487_v50 }
0x1c49   :  { %4409 = vmatprep.mubr.msk.f32.mxu0 %vm192_vm2, %v3496_v51 }
0x1c4b   :  { %v3489_v53 = vpop.permute.xlu1 %3488 }
0x1c4c   :  { %v3497_v55 = vsel %vm1630_vm5, %v3495_v48, %v3489_v53  ;;  %v3959_v48 = vld [vmem:[%s5419_s9 + $0x78] sm:$0xff] }
0x1c4d   :  { %4410 = vmatmul.mubr.msk.f32.vlgmr.msra.gmra.mrb[28].mxu0 %vm192_vm2, %v3497_v55  ;;  %v4550_v53 = vpack.c.bf16 %v3959_v48, %v3958_v52  ;;  %v3997_v55 = vld [vmem:[%s5418_s8 + $0x1] ss:$0 sm:$0xff] }
0x1c4e   :  { %4541 = vmatpush3.bf16.msra.mxu0 %v4538_v19 }
0x1c4f   :  { %4543 = vmatprep.subr.bf16.mxu0 %v4542_v22 }
0x1c52   :  { %4545 = vmatpush3.bf16.msra.mxu0 %v4542_v22 }
0x1c53   :  { %4547 = vmatprep.subr.bf16.mxu0 %v4546_v24 }
0x1c56   :  { %4549 = vmatpush3.bf16.msra.mxu0 %v4546_v24 }
0x1c57   :  { %4551 = vmatprep.subr.bf16.mxu0 %v4550_v53 }
0x1c5a   :  { %4553 = vmatpush3.bf16.msra.mxu0 %v4550_v53 }
0x1d20   :  { %v4411_v57 = vpop.f32.mrb[28].mxu0 }
0x1d21   :  { %v3582_v58 = vadd.f32 %v4411_v57, %v3992_v54  ;;  %v3576_v59 = vpop.f32.mrb[29].mxu0 }
0x1d22   :  { %v3577_v60 = vadd.f32 %v3992_v54, %v3576_v59 }
0x1d23   :  { %v3586_v61 = vadd.f32 %v3582_v58, %v5143_v14 }
0x1d24   :  { %v3585_v62 = vadd.f32 %v3577_v60, %v5141_v13  ;;  %v3947_v13 = vld [vmem:[%s5417_s7 + $0x20] sm:$0xff] }
0x1d25   :  { %v3590_v56 = vsel %vm192_vm2, %v3586_v61, 0.0  ;;  %v4530_v10 = vpack.c.bf16 %v3948_v8, %v3947_v13 }
0x1d26   :  { %3591 = vadd.xlane.f32.xlu1 %v3590_v56  ;;  %v3587_v49 = vsel %vm192_vm2, %v3585_v62, 0.0 }
0x1d27   :  { %3588 = vadd.xlane.f32.xlu0 %v3587_v49  ;;  %4531 = vmatprep.subr.bf16.mxu1 %v4530_v10 }
0x1d28   :  { %4533 = vmatpush3.bf16.msra.mxu1 %v4530_v10 }
0x1d29   :  { %4535 = vmatprep.subr.bf16.mxu1 %v4534_v44 }
0x1d2c   :  { %4537 = vmatpush3.bf16.msra.mxu1 %v4534_v44 }
0x1db3   :  { %v3592_v63 = vpop.xlane.xlu1 %3591 }
0x1db4   :  { %v3594_v0 = vmul.f32 0.03125, %v3592_v63  ;;  %v3589_v1 = vpop.xlane.xlu0 %3588 }
0x1db5   :  { %v3593_v2 = vmul.f32 0.03125, %v3589_v1 }
0x1db6   :  { %v3596_v3 = vsub.f32 %v3586_v61, %v3594_v0 }
0x1db7   :  { %v3595_v4 = vsub.f32 %v3585_v62, %v3593_v2  ;;  %v4000_v62 = vld [vmem:[%s5420_s10 + $0x1] ss:$0 sm:$0xff] }
0x1db8   :  { %v3598_v7 = vmul.f32 %v3596_v3, %v3596_v3  ;;  %v3632_v45 = vmul.f32 %v3995_v42, %v3596_v3 }
0x1db9   :  { %v3597_v5 = vmul.f32 %v3595_v4, %v3595_v4  ;;  %v3631_v38 = vmul.f32 %v3995_v42, %v3595_v4 }
0x1dba   :  { %v3602_v14 = vsel %vm192_vm2, %v3598_v7, 0.0 }
0x1dbb   :  { %v3599_v6 = vsel %vm192_vm2, %v3597_v5, 0.0 }
0x1dbc   :  { %3600 = vadd.xlane.f32.xlu0 %v3599_v6 }
0x1dc0   :  { %3603 = vadd.xlane.f32.xlu0 %v3602_v14 }
0x1e49   :  { %v3601_v25 = vpop.xlane.xlu0 %3600 }
0x1e4a   :  { %v3605_v26 = vmul.f32 0.032258064, %v3601_v25 }
0x1e4c   :  { %4655 = vrsqrt.f32 %v3605_v26  ;;  %vm3609_vm0 = vcmp.eq.f32.partialorder %v3605_v26, inf  ;;  %v3612_v30 = vand.u32 2147483648, %v3605_v26  ;;  %vm3611_vm1 = vcmp.eq.f32.partialorder %v3605_v26, 0.0 }
0x1e4d   :  { %v3604_v27 = vpop.xlane.xlu0 %3603 }
0x1e4e   :  { %v3606_v20 = vmul.f32 0.032258064, %v3604_v27 }
0x1e50   :  { %4657 = vrsqrt.f32 %v3606_v20  ;;  %vm3616_vm3 = vcmp.eq.f32.partialorder %v3606_v20, inf  ;;  %v3619_v35 = vand.u32 2147483648, %v3606_v20  ;;  %vm3618_vm4 = vcmp.eq.f32.partialorder %v3606_v20, 0.0 }
0x1e56   :  { %v4656_v28 = vpop.eup %4655 }
0x1e57   :  { %v3608_v29 = vmul.f32 %v4656_v28, %v3605_v26 }
0x1e59   :  { %v3610_v31 = vsel %vm3609_vm0, %v3605_v26, %v3608_v29 }
0x1e5a   :  { %v4658_v17 = vpop.eup %4657  ;;  %v3613_v32 = vsel %vm3611_vm1, %v3612_v30, %v3610_v31  ;;  %v4003_v31 = vld [vmem:[%s5423_s13 + $0x1] ss:$0 sm:$0xff]  ;;  %s4671_s13 = scalar_lea.vmem %s3885_s22, 256 }
0x1e5b   :  { %v3615_v33 = vmul.f32 %v4658_v17, %v3606_v20  ;;  %v3621_v34 = vadd.f32 1e-06, %v3613_v32  ;;  %p4672_p0 = scmp.ne.s32.totalorder %s3885_s22, %s4671_s13  ;;  %p4677_p2 = scmp.lt.s32.totalorder %s4671_s13, %s4671_s13 }
0x1e5d   :  { %v3617_v36 = vsel %vm3616_vm3, %v3606_v20, %v3615_v33  ;;  %4659 = vrcp.f32 %v3621_v34  ;;  %v4004_v34 = vld [vmem:[%s5424_s14 + $0x1] ss:$0 sm:$0xff]  ;;  %p4678_p3 = por %p4677_p2, %p4676_p1 }
0x1e5e   :  { %v3620_v37 = vsel %vm3618_vm4, %v3619_v35, %v3617_v36 }
0x1e5f   :  { %v3622_v43 = vadd.f32 1e-06, %v3620_v37  ;;  %p4679_p4 = pnand %p4678_p3, %p4672_p0 }
0x1e61   :  { %4661 = vrcp.f32 %v3622_v43 }
0x1e67   :  { %v4660_v39 = vpop.eup %4659 }
0x1e68   :  { %v3633_v41 = vmul.f32 %v4660_v39, %v3631_v38 }
0x1e6a   :  { %v3641_v46 = vadd.f32 %v3996_v40, %v3633_v41 }
0x1e6b   :  { %v4662_v47 = vpop.eup %4661 }
0x1e6c   :  { %v3634_v50 = vmul.f32 %v4662_v47, %v3632_v45  ;;  %4420 = vmatprep.mubr.msk.f32.mxu1 %vm192_vm2, %v3641_v46 }
0x1e6e   :  { %v3642_v51 = vadd.f32 %v3996_v40, %v3634_v50 }
0x1e70   :  { %4421 = vmatmul.mubr.msk.f32.vlgmr.msra.gmra.mrb[48].mxu1 %vm192_vm2, %v3642_v51 }
0x1f43   :  { %v4422_v54 = vpop.f32.mrb[48].mxu1 }
0x1f44   :  { %v3727_v57 = vadd.f32 %v4422_v54, %v3997_v55  ;;  %v3721_v58 = vpop.f32.mrb[49].mxu1 }
0x1f45   :  { %v3722_v59 = vadd.f32 %v3997_v55, %v3721_v58 }
0x1f46   :  { %v3731_v61 = vmax.f32 %v3727_v57, 0.0 }
0x1f47   :  { %v3730_v60 = vmax.f32 %v3722_v59, 0.0 }
0x1f49   :  { %4439 = vmatprep.mubr.msk.f32.mxu0 %vm1875_vm11, %v3730_v60 }
0x1f4a   :  { %4440 = vmatmul.mubr.msk.f32.vlgmr.msra.gmra.mrb[30].mxu0 %vm1875_vm11, %v3731_v61 }
0x201d   :  { %v4441_v56 = vpop.f32.mrb[30].mxu0 }
0x201e   :  { %v3816_v49 = vadd.f32 %v4441_v56, %v4000_v62  ;;  %v3810_v63 = vpop.f32.mrb[31].mxu0 }
0x201f   :  { %v3811_v0 = vadd.f32 %v4000_v62, %v3810_v63 }
0x2020   :  { %v3820_v1 = vadd.f32 %v3816_v49, %v3642_v51 }
0x2021   :  { %v3819_v2 = vadd.f32 %v3811_v0, %v3641_v46 }
0x2022   :  { %v3824_v3 = vsel %vm192_vm2, %v3820_v1, 0.0 }
0x2023   :  { %3825 = vadd.xlane.f32.xlu0 %v3824_v3  ;;  %v3821_v4 = vsel %vm192_vm2, %v3819_v2, 0.0 }
0x2024   :  { %3822 = vadd.xlane.f32.xlu1 %v3821_v4 }
0x20b0   :  { %v3826_v5 = vpop.xlane.xlu0 %3825 }
0x20b1   :  { %v3828_v6 = vmul.f32 0.03125, %v3826_v5  ;;  %v3823_v7 = vpop.xlane.xlu1 %3822 }
0x20b2   :  { %v3827_v14 = vmul.f32 0.03125, %v3823_v7 }
0x20b3   :  { %v3830_v13 = vsub.f32 %v3820_v1, %v3828_v6 }
0x20b4   :  { %v3829_v8 = vsub.f32 %v3819_v2, %v3827_v14 }
0x20b5   :  { %v3832_v9 = vmul.f32 %v3830_v13, %v3830_v13  ;;  %v3866_v17 = vmul.f32 %v4003_v31, %v3830_v13 }
0x20b6   :  { %v3831_v10 = vmul.f32 %v3829_v8, %v3829_v8  ;;  %v3865_v33 = vmul.f32 %v4003_v31, %v3829_v8 }
0x20b7   :  { %v3836_v11 = vsel %vm192_vm2, %v3832_v9, 0.0 }
0x20b8   :  { %3837 = vadd.xlane.f32.xlu0 %v3836_v11  ;;  %v3833_v44 = vsel %vm192_vm2, %v3831_v10, 0.0 }
0x20b9   :  { %3834 = vadd.xlane.f32.xlu1 %v3833_v44 }
0x2145   :  { %v3838_v12 = vpop.xlane.xlu0 %3837 }
0x2146   :  { %v3840_v15 = vmul.f32 0.032258064, %v3838_v12  ;;  %v3835_v16 = vpop.xlane.xlu1 %3834 }
0x2147   :  { %v3839_v19 = vmul.f32 0.032258064, %v3835_v16 }
0x2148   :  { %4663 = vrsqrt.f32 %v3840_v15  ;;  %vm3850_vm5 = vcmp.eq.f32.partialorder %v3840_v15, inf  ;;  %v3853_v21 = vand.u32 2147483648, %v3840_v15  ;;  %vm3852_vm6 = vcmp.eq.f32.partialorder %v3840_v15, 0.0 }
0x2149   :  { %4665 = vrsqrt.f32 %v3839_v19  ;;  %vm3843_vm7 = vcmp.eq.f32.partialorder %v3839_v19, inf  ;;  %v3846_v26 = vand.u32 2147483648, %v3839_v19  ;;  %vm3845_vm8 = vcmp.eq.f32.partialorder %v3839_v19, 0.0 }
0x2152   :  { %v4664_v18 = vpop.eup %4663 }
0x2153   :  { %v4666_v22 = vpop.eup %4665  ;;  %v3849_v23 = vmul.f32 %v4664_v18, %v3840_v15 }
0x2154   :  { %v3842_v24 = vmul.f32 %v4666_v22, %v3839_v19 }
0x2155   :  { %v3851_v25 = vsel %vm3850_vm5, %v3840_v15, %v3849_v23 }
0x2156   :  { %v3854_v27 = vsel %vm3852_vm6, %v3853_v21, %v3851_v25  ;;  %v3844_v20 = vsel %vm3843_vm7, %v3839_v19, %v3842_v24 }
0x2157   :  { %v3856_v28 = vadd.f32 1e-06, %v3854_v27  ;;  %v3847_v29 = vsel %vm3845_vm8, %v3846_v26, %v3844_v20 }
0x2158   :  { %v3855_v30 = vadd.f32 1e-06, %v3847_v29 }
0x2159   :  { %4667 = vrcp.f32 %v3856_v28 }
0x215a   :  { %4669 = vrcp.f32 %v3855_v30 }
0x2163   :  { %v4668_v32 = vpop.eup %4667 }
0x2164   :  { %v4670_v35 = vpop.eup %4669  ;;  %v3868_v36 = vmul.f32 %v4668_v32, %v3866_v17 }
0x2165   :  { %v3867_v37 = vmul.f32 %v4670_v35, %v3865_v33 }
0x2166   :  { %v3876_v43 = vadd.f32 %v4004_v34, %v3868_v36 }
0x2167   :  { %v3875_v42 = vadd.f32 %v4004_v34, %v3867_v37 }
0x2168   :  { %3878 = vst.msk [vmem:[#allocation2 + $0x8] sm:$0xff] %vm192_vm2, %v3876_v43 }
0x2169   :  { %3877 = vst.msk [vmem:[#allocation2] sm:$0xff] %vm192_vm2, %v3875_v42 }
0x216a   :  { %4682 = shalt.err (!%p4679_p4)
}
0x216b   :  { %s4683_s24 = scalar_lea.hbm %s5425_s15, 256 }
0x216c   :  { %p4684_p5 = scmp.ne.s32.totalorder %s5425_s15, %s4683_s24  ;;  %p4687_p6 = scmp.lt.u32.totalorder %s4683_s24, %s5425_s15 }
0x216e   :  { %p4689_p7 = pnand %p4687_p6, %p4684_p5 }
0x2170   :  { %4692 = shalt.err (!%p4689_p7)
}
0x2171   :  { %s4714_s28 = smov 128  }
0x2172   :  { %3890 = dma.vmem_to_hbm [thread:$0]  %s3885_s22, 256, %s5425_s15, [#allocation3], %s4714_s28, %s4714_s28, %s5441_s21  }
0x2173   :  { %4693 = dma.done.wait [#allocation3], 256  }
0x2174   :  { %4694 = vsyncadd [#allocation3], 4294967040 }
0x2175   :  { %3894 = vsyncpa [#allocation3], 1 }

</bundles_post_ra>
